<compile_context>
chip_gen: v7x
topology: tpu7x:2x2x1
jax: 0.10.0
libtpu: 0.0.40
codegen_flags: <defaults>
</compile_context>

<pallas_src>
import math

import jax
import jax.numpy as jnp
from jax.experimental import pallas as pl
from jax.experimental.pallas import tpu as pltpu

# ---- model sizes (small, consistent with the module) ----
N = 8              # batch
D = 16             # in_features
R = 2              # number of region SPNs (random splits)
I = 4              # leaf distributions per region
C = 3              # classes
IC = R * I * I     # root Sum in_channels
HALF = D // 2
_HALF_LOG_2PI = 0.5 * math.log(2.0 * math.pi)


def _rat_spn_kernel(x_ref, prm_ref, lw_ref, out_ref):
    """Fused RAT-SPN forward (all regions + root Sum), single invocation.

    x_ref  : (N, D)        raw inputs (original feature order)
    prm_ref: (2*IC, D)     rows [0, IC)  = per-channel expanded means,
                           rows [IC,2IC) = per-channel expanded 1/sigma
                           (permutation + cross-product absorbed at init)
    lw_ref : (C, IC)       log_softmax(root weights) + per-channel constant
    out_ref: (N, C)        class-conditional log-densities
    """
    x = x_ref[...]                                                    # (N, D)
    mu = prm_ref[:IC, :]                                              # (IC, D)
    isg = prm_ref[IC:, :]                                             # (IC, D)

    # independent-Gaussian log-prob (quadratic part) summed over all features
    z = (x[:, None, :] - mu[None, :, :]) * isg[None, :, :]            # (N, IC, D)
    f = -0.5 * jnp.sum(z * z, axis=2)                                 # (N, IC)

    # root Sum: weights (incl. normalization consts) pre-logged; just logsumexp
    t = f[:, None, :] + lw_ref[...][None, :, :]                       # (N, C, IC)
    m = jnp.max(t, axis=2)                                            # (N, C)
    s = jnp.sum(jnp.exp(t - m[:, :, None]), axis=2)                   # (N, C)
    out_ref[...] = m + jnp.log(s)


@jax.jit
def rat_spn_forward(x, mu_isg, logw_c):
    """x: (N, D); mu_isg: (2*IC, D); logw_c: (C, IC)."""
    n = x.shape[0]
    return pl.pallas_call(
        _rat_spn_kernel,
        out_shape=jax.ShapeDtypeStruct((n, C), jnp.float32),
        # no grid: single invocation, whole arrays resident in VMEM
        in_specs=[
            pl.BlockSpec(memory_space=pltpu.MemorySpace.VMEM),
            pl.BlockSpec(memory_space=pltpu.MemorySpace.VMEM),
            pl.BlockSpec(memory_space=pltpu.MemorySpace.VMEM),
        ],
        out_specs=pl.BlockSpec(memory_space=pltpu.MemorySpace.VMEM),
    )(x, mu_isg, logw_c)


# ---------------- deterministic parameter init (synthetic) ----------------
def _trunc_normal(key, shape, std):
    # truncated_normal_(..., std): samples restricted to (-2, 2), then * std.
    return jnp.clip(jax.random.normal(key, shape), -2.0, 2.0) * std


def init_params(key):
    k_perm, k_mu, k_sig, k_w = jax.random.split(key, 4)
    perms = jnp.stack(
        [jax.random.permutation(jax.random.fold_in(k_perm, r), D) for r in range(R)]
    )                                                                  # (R, D)
    mus = _trunc_normal(k_mu, (R, I, D), std=1.0).astype(jnp.float32)
    sigmas = (0.5 + jax.random.uniform(k_sig, (R, I, D))).astype(jnp.float32)
    # root Sum: sum_weights shape (in_features=1, in_channels=IC, out_channels=C)
    root_w = _trunc_normal(k_w, (1, IC, C), std=0.5).astype(jnp.float32)
    return perms, mus, sigmas, root_w


def precompute(perms, mus, sigmas, root_w):
    """All parameter-only math, hoisted out of the forward hot path.

    Builds expanded per-channel leaf parameters in ORIGINAL feature order:
    channel c = r*I*I + i*I + j uses leaf i's params on the region's first
    HALF (permuted) features and leaf j's params on the second HALF, scattered
    back through the region permutation so the kernel needs no gather and no
    cross-product.  Also folds log_softmax(root weights) + Gaussian constants
    into a single (C, IC) array.
    """
    mu_rows, sg_rows = [], []
    for r in range(R):
        # permuted-order expanded params: [i*I+j, d]
        mu_l = jnp.broadcast_to(mus[r, :, None, :HALF], (I, I, HALF))
        mu_r = jnp.broadcast_to(mus[r, None, :, HALF:], (I, I, HALF))
        sg_l = jnp.broadcast_to(sigmas[r, :, None, :HALF], (I, I, HALF))
        sg_r = jnp.broadcast_to(sigmas[r, None, :, HALF:], (I, I, HALF))
        mu_perm = jnp.concatenate([mu_l, mu_r], axis=2).reshape(I * I, D)
        sg_perm = jnp.concatenate([sg_l, sg_r], axis=2).reshape(I * I, D)
        # scatter permuted columns back to original feature positions
        mu_rows.append(jnp.zeros((I * I, D), jnp.float32).at[:, perms[r]].set(mu_perm))
        sg_rows.append(jnp.ones((I * I, D), jnp.float32).at[:, perms[r]].set(sg_perm))
    mu_exp = jnp.concatenate(mu_rows, axis=0)                          # (IC, D)
    sg_exp = jnp.concatenate(sg_rows, axis=0)                          # (IC, D)

    isg_exp = 1.0 / sg_exp                                             # (IC, D)
    chan_const = -jnp.sum(jnp.log(sg_exp), axis=1) - D * _HALF_LOG_2PI  # (IC,)

    logw = jax.nn.log_softmax(root_w[0], axis=0)                       # (IC, C)
    logw_c = (logw.T + chan_const[None, :]).astype(jnp.float32)        # (C, IC)

    mu_isg = jnp.concatenate([mu_exp, isg_exp], axis=0).astype(jnp.float32)  # (2*IC, D)
    return mu_isg, logw_c


# ---------------- pure-JAX reference of the same forward ----------------
def ref_forward(x, perms, mus, sigmas, root_w):
    outs = []
    for r in range(R):
        xp = x[:, perms[r]]
        z = (xp[:, None, :] - mus[r][None]) / sigmas[r][None]          # (N, I, D)
        logp = -0.5 * z * z - jnp.log(sigmas[r])[None] - _HALF_LOG_2PI
        left = logp[:, :, :HALF].sum(-1)                               # (N, I)
        right = logp[:, :, HALF:].sum(-1)                              # (N, I)
        prod = left[:, :, None] + right[:, None, :]                    # (N, I, I)
        outs.append(prod.reshape(x.shape[0], I * I))
    f = jnp.concatenate(outs, axis=1)                                  # (N, IC)
    logw = jax.nn.log_softmax(root_w, axis=1)                          # (1, IC, C)
    return jax.nn.logsumexp(f[:, :, None] + logw[0][None], axis=1)     # (N, C)


if __name__ == "__main__":
    key = jax.random.PRNGKey(0)
    k_x, k_p = jax.random.split(key)
    x = jax.random.normal(k_x, (N, D), dtype=jnp.float32)
    perms, mus, sigmas, root_w = init_params(k_p)
    mu_isg, logw_c = precompute(perms, mus, sigmas, root_w)

    out = rat_spn_forward(x, mu_isg, logw_c)
    out = jax.block_until_ready(out)

    ref = ref_forward(x, perms, mus, sigmas, root_w)
    assert out.shape == (N, C), out.shape
    assert jnp.allclose(out, ref, rtol=1e-5, atol=1e-4), (out, ref)
    print("KERNEL_OK")
</pallas_src>

<mosaic_0001>
module attributes {stable_mosaic.version = 11 : i64} {
  func.func @_rat_spn_kernel(%arg0: memref<8x16xf32, #tpu.memory_space<vmem>>, %arg1: memref<64x16xf32, #tpu.memory_space<vmem>>, %arg2: memref<3x32xf32, #tpu.memory_space<vmem>>, %arg3: memref<8x3xf32, #tpu.memory_space<vmem>>) attributes {dimension_semantics = [], scalar_prefetch = 0 : i64, scratch_operands = 0 : i64, tpu.core_type = #tpu.core_type<tc>} {
    %c0 = arith.constant 0 : index
    %c0_0 = arith.constant 0 : index
    %0 = vector.load %arg0[%c0, %c0_0] : memref<8x16xf32, #tpu.memory_space<vmem>>, vector<8x16xf32>
    %c0_1 = arith.constant 0 : index
    %c0_2 = arith.constant 0 : index
    %1 = vector.load %arg1[%c0_1, %c0_2] : memref<64x16xf32, #tpu.memory_space<vmem>>, vector<32x16xf32>
    %c32 = arith.constant 32 : index
    %c0_3 = arith.constant 0 : index
    %2 = vector.load %arg1[%c32, %c0_3] : memref<64x16xf32, #tpu.memory_space<vmem>>, vector<32x16xf32>
    %3 = vector.shape_cast %0 : vector<8x16xf32> to vector<8x1x16xf32>
    %4 = vector.shape_cast %1 : vector<32x16xf32> to vector<1x32x16xf32>
    %5 = vector.broadcast %3 : vector<8x1x16xf32> to vector<8x32x16xf32>
    %6 = vector.broadcast %4 : vector<1x32x16xf32> to vector<8x32x16xf32>
    %7 = arith.subf %5, %6 : vector<8x32x16xf32>
    %8 = vector.shape_cast %2 : vector<32x16xf32> to vector<1x32x16xf32>
    %9 = vector.broadcast %8 : vector<1x32x16xf32> to vector<8x32x16xf32>
    %10 = arith.mulf %7, %9 : vector<8x32x16xf32>
    %11 = arith.mulf %10, %10 : vector<8x32x16xf32>
    %cst = arith.constant dense<0.000000e+00> : vector<8x32xf32>
    %12 = vector.multi_reduction <add>, %11, %cst [2] : vector<8x32x16xf32> to vector<8x32xf32>
    %cst_4 = arith.constant -5.000000e-01 : f32
    %13 = vector.broadcast %cst_4 : f32 to vector<8x32xf32>
    %14 = arith.mulf %13, %12 : vector<8x32xf32>
    %15 = vector.shape_cast %14 : vector<8x32xf32> to vector<8x1x32xf32>
    %c0_5 = arith.constant 0 : index
    %c0_6 = arith.constant 0 : index
    %16 = vector.load %arg2[%c0_5, %c0_6] : memref<3x32xf32, #tpu.memory_space<vmem>>, vector<3x32xf32>
    %17 = vector.shape_cast %16 : vector<3x32xf32> to vector<1x3x32xf32>
    %18 = vector.broadcast %15 : vector<8x1x32xf32> to vector<8x3x32xf32>
    %19 = vector.broadcast %17 : vector<1x3x32xf32> to vector<8x3x32xf32>
    %20 = arith.addf %18, %19 : vector<8x3x32xf32>
    %cst_7 = arith.constant dense<0xFF800000> : vector<8x3xf32>
    %21 = vector.multi_reduction <maximumf>, %20, %cst_7 [2] : vector<8x3x32xf32> to vector<8x3xf32>
    %22 = vector.shape_cast %21 : vector<8x3xf32> to vector<8x3x1xf32>
    %23 = vector.broadcast %22 : vector<8x3x1xf32> to vector<8x3x32xf32>
    %24 = arith.subf %20, %23 : vector<8x3x32xf32>
    %25 = math.exp %24 : vector<8x3x32xf32>
    %cst_8 = arith.constant dense<0.000000e+00> : vector<8x3xf32>
    %26 = vector.multi_reduction <add>, %25, %cst_8 [2] : vector<8x3x32xf32> to vector<8x3xf32>
    %27 = math.log %26 : vector<8x3xf32>
    %28 = arith.addf %21, %27 : vector<8x3xf32>
    %c0_9 = arith.constant 0 : index
    %c0_10 = arith.constant 0 : index
    %29 = vector.load %arg3[%c0_9, %c0_10] : memref<8x3xf32, #tpu.memory_space<vmem>>, vector<8x3xf32>
    tpu.vector_store %arg3[%c0_9, %c0_10], %28 {strides = array<i32>} : memref<8x3xf32, #tpu.memory_space<vmem>>, vector<8x3xf32>,
    return
  }
}

</mosaic_0001>

<bundles_post_ra>
// kernel: rat_spn_forward.1
= control target key start
LH: loop header
LB: loop body
LE: loop exit
PB: predicated region body
PF: predicated region fallthrough
CT: control target
= control target key end

     0   :  { %v28_v0 = vlaneseq  ;;  %v3004_v1 = vmov 1966171168   ;;  %vm209_vm0 = vcmask 130048   ;;  %vm900_vm1 = vcmask 130112   ;;  %s4714_s0 = inlined_call_operand.vmem [shape: f32[8,16], index: 0, kind: input, shape index: {}]   ;;  %s4715_s1 = inlined_call_operand.vmem [shape: f32[64,16], index: 1, kind: input, shape index: {}]   ;;  %s4716_s2 = inlined_call_operand.vmem [shape: f32[3,32], index: 2, kind: input, shape index: {}]   ;;  %s4717_s3 = inlined_call_operand.vmem [shape: f32[8,3], index: 3, kind: output, shape index: {}]  }
   0x1   :  { %v26_v2 = vunpack.c.l.s4 %v3004_v1  ;;  %v3031_v6 = vld [vmem:[%s4714_s0] sm:$0xff]  ;;  %v3056_v17 = vld [vmem:[%s4715_s1 + $0x10] sm:$0xff]  ;;  %v3067_v21 = vld [vmem:[%s4715_s1 + $0x18] sm:$0xff]  ;;  %vm907_vm2 = vcmask 195712   ;;  %vm914_vm3 = vcmask 261312   ;;  %vm1353_vm4 = vcmask 1041409  }
   0x2   :  { %v3026_v3 = vshrl.u32 %v28_v0, 7  ;;  %v890_v4 = vand.u32 127, %v28_v0  ;;  %v3062_v20 = vld [vmem:[%s4715_s1] sm:$0xff]  ;;  %v3072_v22 = vld [vmem:[%s4715_s1 + $0x8] sm:$0xff]  ;;  %v3077_v23 = vld [vmem:[%s4715_s1 + $0x30] sm:$0xff]  ;;  %v24_v48 = vcombine.high %v3031_v6, %v3031_v6  ;;  %vm1355_vm5 = vcmask 1042434  }
   0x3   :  { %v27_v5 = vunpack.c.0.s8 %v26_v2  ;;  %v3084_v27 = vld [vmem:[%s4715_s1 + $0x20] sm:$0xff]  ;;  %v3089_v28 = vld [vmem:[%s4715_s1 + $0x38] sm:$0xff]  ;;  %v3094_v29 = vld [vmem:[%s4715_s1 + $0x28] sm:$0xff]  ;;  %vm1379_vm6 = vcmask 256000   ;;  %vm2774_vm7 = vcmask 1043459   ;;  %vm2776_vm8 = vcmask 1044484  }
   0x4   :  { %v3034_v7 = vsub.s32 %v890_v4, %v3026_v3  ;;  %v895_v8 = vadd.s32 4294967288, %v890_v4  ;;  %v902_v9 = vadd.s32 4294967280, %v890_v4  ;;  %v909_v11 = vadd.s32 4294967272, %v890_v4 }
   0x5   :  { %v3037_v10 = vsub.s32 %v27_v5, %v3026_v3  ;;  %v3048_v15 = vsub.s32 0, %v3026_v3  ;;  %vm2778_vm9 = vcmask 1045509   ;;  %vm2780_vm10 = vcmask 1046534  }
   0x6   :  { %v3040_v12 = vsub.s32 %v895_v8, %v3026_v3  ;;  %v3043_v13 = vsub.s32 %v902_v9, %v3026_v3  ;;  %v3051_v16 = vsub.s32 %v909_v11, %v3026_v3  ;;  %vm2782_vm11 = vcmask 1047559  }
   0x7   :  { %v31_v14 = vrot.slane %v3031_v6, %v3037_v10  ;;  %v38_v0 = vrot.slane %v24_v48, %v3037_v10  ;;  %vm2785_vm12 = vcmask 23552  }
   0x9   :  { %v47_v18 = vrot.slane %v31_v14, %v3037_v10  ;;  %v39_v19 = vcombine.high %v31_v14, %v31_v14  ;;  %v54_v11 = vrot.slane %v38_v0, %v3037_v10 }
   0xb   :  { %v76_v24 = vrot.slane %v47_v18, %v3048_v15  ;;  %v61_v25 = vrot.slane %v39_v19, %v3037_v10  ;;  %v69_v26 = vcombine.high %v47_v18, %v47_v18 }
   0xd   :  { %v115_v30 = vsub.f32 %v76_v24, %v3056_v17  ;;  %v113_v31 = vsub.f32 %v76_v24, %v3062_v20  ;;  %v116_v32 = vsub.f32 %v76_v24, %v3067_v21  ;;  %v114_v33 = vsub.f32 %v76_v24, %v3072_v22 }
   0xe   :  { %v80_v34 = vrot.slane %v61_v25, %v3048_v15  ;;  %v84_v35 = vrot.slane %v69_v26, %v3048_v15  ;;  %v71_v57 = vcombine.high %v61_v25, %v61_v25 }
   0xf   :  { %v147_v36 = vmul.f32 %v115_v30, %v3077_v23  ;;  %v145_v37 = vmul.f32 %v113_v31, %v3084_v27  ;;  %v148_v38 = vmul.f32 %v116_v32, %v3089_v28  ;;  %v146_v39 = vmul.f32 %v114_v33, %v3094_v29 }
  0x10   :  { %v118_v40 = vsub.f32 %v80_v34, %v3072_v22  ;;  %v117_v41 = vsub.f32 %v80_v34, %v3062_v20  ;;  %v120_v42 = vsub.f32 %v80_v34, %v3067_v21  ;;  %v119_v43 = vsub.f32 %v80_v34, %v3056_v17 }
  0x11   :  { %v179_v44 = vmul.f32 %v147_v36, %v147_v36  ;;  %v177_v45 = vmul.f32 %v145_v37, %v145_v37  ;;  %v180_v46 = vmul.f32 %v148_v38, %v148_v38  ;;  %v178_v47 = vmul.f32 %v146_v39, %v146_v39 }
  0x12   :  { %v150_v49 = vmul.f32 %v118_v40, %v3094_v29  ;;  %v149_v50 = vmul.f32 %v117_v41, %v3084_v27  ;;  %v152_v53 = vmul.f32 %v120_v42, %v3089_v28  ;;  %v151_v54 = vmul.f32 %v119_v43, %v3077_v23 }
  0x13   :  { %v216_v51 = vsel %vm209_vm0, %v179_v44, 0.0  ;;  %v210_v52 = vsel %vm209_vm0, %v177_v45, 0.0  ;;  %v219_v55 = vsel %vm209_vm0, %v180_v46, 0.0  ;;  %v213_v56 = vsel %vm209_vm0, %v178_v47, 0.0 }
  0x14   :  { %217 = vadd.xlane.f32.xlu1 %v216_v51  ;;  %211 = vadd.xlane.f32.xlu0 %v210_v52  ;;  %v182_v58 = vmul.f32 %v150_v49, %v150_v49  ;;  %v181_v59 = vmul.f32 %v149_v50, %v149_v50  ;;  %v122_v60 = vsub.f32 %v84_v35, %v3072_v22 }
  0x15   :  { %v121_v61 = vsub.f32 %v84_v35, %v3062_v20  ;;  %v184_v62 = vmul.f32 %v152_v53, %v152_v53  ;;  %v183_v63 = vmul.f32 %v151_v54, %v151_v54  ;;  %v124_v2 = vsub.f32 %v84_v35, %v3067_v21 }
  0x16   :  { %v154_v1 = vmul.f32 %v122_v60, %v3094_v29  ;;  %v123_v4 = vsub.f32 %v84_v35, %v3056_v17  ;;  %v225_v5 = vsel %vm209_vm0, %v182_v58, 0.0  ;;  %v222_v6 = vsel %vm209_vm0, %v181_v59, 0.0 }
  0x17   :  { %v153_v8 = vmul.f32 %v121_v61, %v3084_v27  ;;  %v88_v9 = vrot.slane %v71_v57, %v3048_v15  ;;  %v231_v14 = vsel %vm209_vm0, %v184_v62, 0.0  ;;  %v156_v19 = vmul.f32 %v124_v2, %v3089_v28 }
  0x18   :  { %220 = vadd.xlane.f32.xlu1 %v219_v55  ;;  %214 = vadd.xlane.f32.xlu0 %v213_v56  ;;  %v186_v18 = vmul.f32 %v154_v1, %v154_v1  ;;  %v155_v24 = vmul.f32 %v123_v4, %v3077_v23  ;;  %v228_v25 = vsel %vm209_vm0, %v183_v63, 0.0  ;;  %v92_v32 = vrot.slane %v54_v11, %v3048_v15 }
  0x19   :  { %v185_v26 = vmul.f32 %v153_v8, %v153_v8  ;;  %v126_v30 = vsub.f32 %v88_v9, %v3072_v22  ;;  %v125_v31 = vsub.f32 %v88_v9, %v3062_v20  ;;  %v40_v33 = vcombine.high %v38_v0, %v38_v0 }
  0x1a   :  { %v237_v34 = vsel %vm209_vm0, %v186_v18, 0.0  ;;  %v188_v35 = vmul.f32 %v156_v19, %v156_v19  ;;  %v187_v36 = vmul.f32 %v155_v24, %v155_v24  ;;  %v128_v37 = vsub.f32 %v88_v9, %v3067_v21 }
  0x1b   :  { %v234_v38 = vsel %vm209_vm0, %v185_v26, 0.0  ;;  %v158_v39 = vmul.f32 %v126_v30, %v3094_v29  ;;  %v157_v40 = vmul.f32 %v125_v31, %v3084_v27  ;;  %v127_v41 = vsub.f32 %v88_v9, %v3056_v17 }
  0x1c   :  { %226 = vadd.xlane.f32.xlu1 %v225_v5  ;;  %223 = vadd.xlane.f32.xlu0 %v222_v6  ;;  %v130_v42 = vsub.f32 %v92_v32, %v3072_v22  ;;  %v129_v43 = vsub.f32 %v92_v32, %v3062_v20  ;;  %v243_v44 = vsel %vm209_vm0, %v188_v35, 0.0  ;;  %v160_v45 = vmul.f32 %v128_v37, %v3089_v28 }
  0x1d   :  { %v68_v46 = vrot.slane %v40_v33, %v3037_v10  ;;  %v240_v47 = vsel %vm209_vm0, %v187_v36, 0.0  ;;  %v190_v48 = vmul.f32 %v158_v39, %v158_v39  ;;  %v189_v49 = vmul.f32 %v157_v40, %v157_v40 }
  0x1e   :  { %v159_v50 = vmul.f32 %v127_v41, %v3077_v23  ;;  %v162_v51 = vmul.f32 %v130_v42, %v3094_v29  ;;  %v161_v52 = vmul.f32 %v129_v43, %v3084_v27  ;;  %v192_v53 = vmul.f32 %v160_v45, %v160_v45 }
  0x1f   :  { %v132_v54 = vsub.f32 %v92_v32, %v3067_v21  ;;  %v131_v55 = vsub.f32 %v92_v32, %v3056_v17  ;;  %v249_v56 = vsel %vm209_vm0, %v190_v48, 0.0  ;;  %v246_v10 = vsel %vm209_vm0, %v189_v49, 0.0 }
  0x20   :  { %232 = vadd.xlane.f32.xlu1 %v231_v14  ;;  %229 = vadd.xlane.f32.xlu0 %v228_v25  ;;  %v191_v57 = vmul.f32 %v159_v50, %v159_v50  ;;  %v96_v58 = vrot.slane %v68_v46, %v3048_v15  ;;  %v70_v59 = vcombine.high %v54_v11, %v54_v11  ;;  %v255_v60 = vsel %vm209_vm0, %v192_v53, 0.0 }
  0x21   :  { %v194_v61 = vmul.f32 %v162_v51, %v162_v51  ;;  %v193_v62 = vmul.f32 %v161_v52, %v161_v52  ;;  %v164_v63 = vmul.f32 %v132_v54, %v3089_v28  ;;  %v163_v1 = vmul.f32 %v131_v55, %v3077_v23 }
  0x22   :  { %v252_v0 = vsel %vm209_vm0, %v191_v57, 0.0  ;;  %v134_v2 = vsub.f32 %v96_v58, %v3072_v22  ;;  %v133_v4 = vsub.f32 %v96_v58, %v3062_v20  ;;  %v100_v5 = vrot.slane %v70_v59, %v3048_v15 }
  0x23   :  { %v261_v6 = vsel %vm209_vm0, %v194_v61, 0.0  ;;  %v258_v8 = vsel %vm209_vm0, %v193_v62, 0.0  ;;  %v196_v9 = vmul.f32 %v164_v63, %v164_v63  ;;  %v136_v11 = vsub.f32 %v96_v58, %v3067_v21 }
  0x24   :  { %238 = vadd.xlane.f32.xlu1 %v237_v34  ;;  %235 = vadd.xlane.f32.xlu0 %v234_v38  ;;  %v195_v14 = vmul.f32 %v163_v1, %v163_v1  ;;  %v166_v18 = vmul.f32 %v134_v2, %v3094_v29  ;;  %v165_v19 = vmul.f32 %v133_v4, %v3084_v27  ;;  %v3209_v4 = vsub.s32 1, %v3026_v3 }
  0x25   :  { %v135_v24 = vsub.f32 %v96_v58, %v3056_v17  ;;  %v138_v25 = vsub.f32 %v100_v5, %v3072_v22  ;;  %v267_v26 = vsel %vm209_vm0, %v196_v9, 0.0  ;;  %v168_v30 = vmul.f32 %v136_v11, %v3089_v28 }
  0x26   :  { %v137_v31 = vsub.f32 %v100_v5, %v3062_v20  ;;  %v72_v32 = vcombine.high %v68_v46, %v68_v46  ;;  %v264_v33 = vsel %vm209_vm0, %v195_v14, 0.0  ;;  %v198_v34 = vmul.f32 %v166_v18, %v166_v18 }
  0x27   :  { %v197_v35 = vmul.f32 %v165_v19, %v165_v19  ;;  %v167_v36 = vmul.f32 %v135_v24, %v3077_v23  ;;  %v170_v37 = vmul.f32 %v138_v25, %v3094_v29  ;;  %v140_v38 = vsub.f32 %v100_v5, %v3067_v21 }
  0x28   :  { %244 = vadd.xlane.f32.xlu1 %v243_v44  ;;  %241 = vadd.xlane.f32.xlu0 %v240_v47  ;;  %v200_v39 = vmul.f32 %v168_v30, %v168_v30  ;;  %v169_v40 = vmul.f32 %v137_v31, %v3084_v27  ;;  %v139_v41 = vsub.f32 %v100_v5, %v3056_v17  ;;  %v273_v42 = vsel %vm209_vm0, %v198_v34, 0.0 }
  0x29   :  { %v270_v43 = vsel %vm209_vm0, %v197_v35, 0.0  ;;  %v199_v44 = vmul.f32 %v167_v36, %v167_v36  ;;  %v104_v45 = vrot.slane %v72_v32, %v3048_v15  ;;  %v172_v46 = vmul.f32 %v140_v38, %v3089_v28 }
  0x2a   :  { %v202_v47 = vmul.f32 %v170_v37, %v170_v37  ;;  %v201_v48 = vmul.f32 %v169_v40, %v169_v40  ;;  %v171_v49 = vmul.f32 %v139_v41, %v3077_v23  ;;  %v279_v50 = vsel %vm209_vm0, %v200_v39, 0.0 }
  0x2b   :  { %v276_v51 = vsel %vm209_vm0, %v199_v44, 0.0  ;;  %v142_v52 = vsub.f32 %v104_v45, %v3072_v22  ;;  %v141_v53 = vsub.f32 %v104_v45, %v3062_v20  ;;  %v144_v59 = vsub.f32 %v104_v45, %v3067_v21 }
  0x2c   :  { %250 = vadd.xlane.f32.xlu1 %v249_v56  ;;  %247 = vadd.xlane.f32.xlu0 %v246_v10  ;;  %v285_v54 = vsel %vm209_vm0, %v202_v47, 0.0  ;;  %v282_v55 = vsel %vm209_vm0, %v201_v48, 0.0  ;;  %v204_v56 = vmul.f32 %v172_v46, %v172_v46  ;;  %v203_v10 = vmul.f32 %v171_v49, %v171_v49 }
  0x2d   :  { %v174_v57 = vmul.f32 %v142_v52, %v3094_v29  ;;  %v173_v58 = vmul.f32 %v141_v53, %v3084_v27  ;;  %v176_v63 = vmul.f32 %v144_v59, %v3089_v28  ;;  %v3005_v5 = vmov 0  }
  0x2e   :  { %v291_v20 = vsel %vm209_vm0, %v204_v56, 0.0  ;;  %v288_v22 = vsel %vm209_vm0, %v203_v10, 0.0  ;;  %2794 = vset.pattern.permute.xlu1 %v3005_v5  ;;  %2793 = vset.pattern.permute.xlu0 %v3005_v5 }
  0x2f   :  { %v206_v61 = vmul.f32 %v174_v57, %v174_v57  ;;  %v205_v62 = vmul.f32 %v173_v58, %v173_v58  ;;  %v208_v29 = vmul.f32 %v176_v63, %v176_v63 }
  0x30   :  { %256 = vadd.xlane.f32.xlu1 %v255_v60  ;;  %253 = vadd.xlane.f32.xlu0 %v252_v0  ;;  %v143_v60 = vsub.f32 %v104_v45, %v3056_v17 }
  0x31   :  { %v297_v27 = vsel %vm209_vm0, %v206_v61, 0.0  ;;  %v294_v21 = vsel %vm209_vm0, %v205_v62, 0.0  ;;  %v303_v1 = vsel %vm209_vm0, %v208_v29, 0.0 }
  0x32   :  { %v175_v0 = vmul.f32 %v143_v60, %v3077_v23  ;;  %v338_v23 = vld [vmem:[%s4716_s2] sm:$0x7] }
  0x33   :  { %v343_v28 = vrot.slane %v338_v23, %v3048_v15 }
  0x34   :  { %262 = vadd.xlane.f32.xlu1 %v261_v6  ;;  %259 = vadd.xlane.f32.xlu0 %v258_v8  ;;  %v207_v17 = vmul.f32 %v175_v0, %v175_v0  ;;  %v362_v6 = vrot.slane %v338_v23, %v3209_v4  ;;  %v3213_v8 = vsub.s32 2, %v3026_v3 }
  0x36   :  { %v300_v2 = vsel %vm209_vm0, %v207_v17, 0.0  ;;  %v381_v9 = vrot.slane %v338_v23, %v3213_v8 }
  0x38   :  { %268 = vadd.xlane.f32.xlu1 %v267_v26  ;;  %265 = vadd.xlane.f32.xlu0 %v264_v33 }
  0x3c   :  { %274 = vadd.xlane.f32.xlu1 %v273_v42  ;;  %271 = vadd.xlane.f32.xlu0 %v270_v43 }
  0x40   :  { %280 = vadd.xlane.f32.xlu1 %v279_v50  ;;  %277 = vadd.xlane.f32.xlu0 %v276_v51 }
  0x44   :  { %286 = vadd.xlane.f32.xlu1 %v285_v54  ;;  %283 = vadd.xlane.f32.xlu0 %v282_v55 }
  0x48   :  { %292 = vadd.xlane.f32.xlu1 %v291_v20  ;;  %289 = vadd.xlane.f32.xlu0 %v288_v22 }
  0x4c   :  { %298 = vadd.xlane.f32.xlu1 %v297_v27  ;;  %295 = vadd.xlane.f32.xlu0 %v294_v21 }
  0x50   :  { %304 = vadd.xlane.f32.xlu1 %v303_v1  ;;  %301 = vadd.xlane.f32.xlu0 %v300_v2 }
  0x61   :  { %349 = vbcast.lane.b32.xlu1 %v343_v28, 264 }
  0x65   :  { %353 = vbcast.lane.b32.xlu1 %v343_v28, 272 }
  0x66   :  { %345 = vbcast.lane.b32.xlu0 %v343_v28, 256 }
  0x69   :  { %357 = vbcast.lane.b32.xlu1 %v343_v28, 280 }
  0x6a   :  { %364 = vbcast.lane.b32.xlu0 %v362_v6, 256 }
  0x6d   :  { %368 = vbcast.lane.b32.xlu1 %v362_v6, 264 }
  0x6e   :  { %372 = vbcast.lane.b32.xlu0 %v362_v6, 272 }
  0x71   :  { %376 = vbcast.lane.b32.xlu1 %v362_v6, 280 }
  0x72   :  { %383 = vbcast.lane.b32.xlu0 %v381_v9, 256 }
  0x75   :  { %387 = vbcast.lane.b32.xlu1 %v381_v9, 264 }
  0x76   :  { %391 = vbcast.lane.b32.xlu0 %v381_v9, 272 }
  0x79   :  { %395 = vbcast.lane.b32.xlu1 %v381_v9, 280 }
  0xa1   :  { %v218_v11 = vpop.xlane.xlu1 %217  ;;  %v212_v14 = vpop.xlane.xlu0 %211 }
  0xa2   :  { %v306_v54 = vmul.f32 -0.5, %v212_v14  ;;  %v308_v59 = vmul.f32 -0.5, %v218_v11 }
  0xa5   :  { %v221_v18 = vpop.xlane.xlu1 %220  ;;  %v215_v19 = vpop.xlane.xlu0 %214 }
  0xa6   :  { %v307_v55 = vmul.f32 -0.5, %v215_v19  ;;  %v309_v61 = vmul.f32 -0.5, %v221_v18 }
  0xa9   :  { %v3216_v24 = vpop.xlane.xlu1 %226  ;;  %v224_v25 = vpop.xlane.xlu0 %223 }
  0xaa   :  { %v310_v14 = vmul.f32 -0.5, %v224_v25 }
  0xad   :  { %v3218_v26 = vpop.xlane.xlu1 %232  ;;  %v3220_v3 = vpop.xlane.xlu0 %229 }
  0xb1   :  { %v3222_v30 = vpop.xlane.xlu1 %238  ;;  %v3224_v31 = vpop.xlane.xlu0 %235 }
  0xb5   :  { %v3226_v32 = vpop.xlane.xlu1 %244  ;;  %v3228_v33 = vpop.xlane.xlu0 %241 }
  0xb9   :  { %v3230_v34 = vpop.xlane.xlu1 %250  ;;  %v3232_v35 = vpop.xlane.xlu0 %247 }
  0xbd   :  { %v3234_v36 = vpop.xlane.xlu1 %256  ;;  %v3236_v37 = vpop.xlane.xlu0 %253 }
  0xc1   :  { %v3238_v38 = vpop.xlane.xlu1 %262  ;;  %v3240_v39 = vpop.xlane.xlu0 %259 }
  0xc5   :  { %v3242_v40 = vpop.xlane.xlu1 %268  ;;  %v3244_v41 = vpop.xlane.xlu0 %265 }
  0xc9   :  { %v3246_v42 = vpop.xlane.xlu1 %274  ;;  %v3248_v43 = vpop.xlane.xlu0 %271 }
  0xcd   :  { %v3250_v44 = vpop.xlane.xlu1 %280  ;;  %v3252_v45 = vpop.xlane.xlu0 %277 }
  0xd1   :  { %v3254_v46 = vpop.xlane.xlu1 %286  ;;  %v3256_v47 = vpop.xlane.xlu0 %283 }
  0xd5   :  { %v3258_v48 = vpop.xlane.xlu1 %292  ;;  %v3260_v49 = vpop.xlane.xlu0 %289 }
  0xd9   :  { %v3262_v50 = vpop.xlane.xlu1 %298  ;;  %v3264_v51 = vpop.xlane.xlu0 %295 }
  0xdd   :  { %v3266_v52 = vpop.xlane.xlu1 %304  ;;  %v3268_v53 = vpop.xlane.xlu0 %301 }
  0xe1   :  { %v3270_v56 = vpop.permute.xlu1 %349  ;;  %v3272_v10 = vpop.permute.xlu0 %345 }
  0xe2   :  { %v3275_v57 = vadd.f32 %v3270_v56, %v307_v55  ;;  %v3278_v58 = vadd.f32 %v3272_v10, %v306_v54 }
  0xe4   :  { %4798 = vst [vmem:[#allocation2_spill] sm:$0xff] %v3275_v57  ;;  %605 = vperm.xlu1 %2794, %v3275_v57   ;;  %602 = vperm.xlu0 %2793, %v3278_v58  }
  0xe5   :  { %v3282_v60 = vpop.permute.xlu1 %353  ;;  %v3284_v20 = vpop.permute.xlu0 %364 }
  0xe6   :  { %v3287_v22 = vadd.f32 %v3282_v60, %v308_v59  ;;  %v3298_v27 = vadd.f32 %v3284_v20, %v306_v54 }
  0xe8   :  { %608 = vperm.xlu1 %2794, %v3287_v22  }
  0xe9   :  { %v3290_v62 = vpop.permute.xlu1 %357  ;;  %v3292_v63 = vpop.permute.xlu0 %372 }
  0xea   :  { %v3295_v0 = vadd.f32 %v3290_v62, %v309_v61  ;;  %v3310_v1 = vadd.f32 %v3292_v63, %v308_v59 }
  0xec   :  { %611 = vperm.xlu0 %2793, %v3295_v0   ;;  %614 = vperm.xlu1 %2794, %v3298_v27  }
  0xed   :  { %v3302_v21 = vpop.permute.xlu1 %368  ;;  %v3304_v29 = vpop.permute.xlu0 %383 }
  0xee   :  { %v3307_v17 = vadd.f32 %v3302_v21, %v307_v55  ;;  %v3320_v28 = vadd.f32 %v3304_v29, %v306_v54  ;;  %v3342_v54 = vadd.f32 %v3272_v10, %v310_v14 }
  0xf0   :  { %4799 = vst [vmem:[#allocation3_spill] sm:$0xff] %v3307_v17  ;;  %617 = vperm.xlu0 %2793, %v3307_v17   ;;  %620 = vperm.xlu1 %2794, %v3310_v1   ;;  %4803 = vst [vmem:[#allocation7_spill] sm:$0xff] %v3342_v54 }
  0xf1   :  { %v3314_v2 = vpop.permute.xlu1 %376  ;;  %v3322_v5 = vpop.permute.xlu0 %391 }
  0xf2   :  { %v3317_v23 = vadd.f32 %v3314_v2, %v309_v61  ;;  %v3332_v11 = vadd.f32 %v3322_v5, %v308_v59 }
  0xf4   :  { %4800 = vst [vmem:[#allocation4_spill] sm:$0xff] %v3317_v23  ;;  %623 = vperm.xlu0 %2793, %v3317_v23   ;;  %626 = vperm.xlu1 %2794, %v3320_v28   ;;  %v311_v23 = vmul.f32 -0.5, %v3216_v24 }
  0xf5   :  { %v3326_v6 = vpop.permute.xlu1 %387 }
  0xf6   :  { %v3329_v9 = vadd.f32 %v3326_v6, %v307_v55  ;;  %v312_v55 = vmul.f32 -0.5, %v3220_v3  ;;  %v3349_v25 = vadd.f32 %v3270_v56, %v311_v23  ;;  %v3361_v3 = vadd.f32 %v3284_v20, %v310_v14 }
  0xf8   :  { %4801 = vst [vmem:[#allocation5_spill] sm:$0xff] %v3329_v9  ;;  %629 = vperm.xlu0 %2793, %v3329_v9   ;;  %632 = vperm.xlu1 %2794, %v3332_v11   ;;  %4804 = vst [vmem:[#allocation8_spill] sm:$0xff] %v3349_v25  ;;  %v3352_v59 = vadd.f32 %v3282_v60, %v312_v55  ;;  %v3369_v9 = vadd.f32 %v3292_v63, %v312_v55 }
  0xf9   :  { %v3336_v18 = vpop.permute.xlu1 %395  ;;  %4807 = vst [vmem:[#allocation11_spill] sm:$0xff] %v3361_v3  ;;  %v3385_v17 = vadd.f32 %v3322_v5, %v312_v55 }
  0xfa   :  { %v3339_v19 = vadd.f32 %v3336_v18, %v309_v61  ;;  %4805 = vst [vmem:[#allocation9_spill] sm:$0xff] %v3352_v59  ;;  %v313_v61 = vmul.f32 -0.5, %v3218_v26  ;;  %4809 = vst [vmem:[#allocation13_spill] sm:$0xff] %v3369_v9 }
  0xfb   :  { %4813 = vst [vmem:[#allocation17_spill] sm:$0xff] %v3385_v17 }
  0xfc   :  { %4802 = vst [vmem:[#allocation6_spill] sm:$0xff] %v3339_v19  ;;  %635 = vperm.xlu0 %2793, %v3339_v19   ;;  %638 = vperm.xlu1 %2794, %v3342_v54   ;;  %v3358_v24 = vadd.f32 %v3290_v62, %v313_v61  ;;  %v3366_v19 = vadd.f32 %v3302_v21, %v311_v23 }
  0xfd   :  { %v3374_v26 = vadd.f32 %v3314_v2, %v313_v61  ;;  %v3391_v57 = vadd.f32 %v3336_v18, %v313_v61  ;;  %v317_v61 = vmul.f32 -0.5, %v3226_v32 }
  0xfe   :  { %4806 = vst [vmem:[#allocation10_spill] sm:$0xff] %v3358_v24  ;;  %4808 = vst [vmem:[#allocation12_spill] sm:$0xff] %v3366_v19 }
  0xff   :  { %4810 = vst [vmem:[#allocation14_spill] sm:$0xff] %v3374_v26  ;;  %4814 = vst [vmem:[#allocation18_spill] sm:$0xff] %v3391_v57  ;;  %v3426_v32 = vadd.f32 %v3314_v2, %v317_v61 }
 0x100   :  { %641 = vperm.xlu0 %2793, %v3349_v25   ;;  %644 = vperm.xlu1 %2794, %v3352_v59   ;;  %v3377_v25 = vadd.f32 %v3304_v29, %v310_v14 }
 0x101   :  { %4822 = vst [vmem:[#allocation26_spill] sm:$0xff] %v3426_v32 }
 0x102   :  { %4811 = vst [vmem:[#allocation15_spill] sm:$0xff] %v3377_v25 }
 0x104   :  { %647 = vperm.xlu0 %2793, %v3358_v24   ;;  %650 = vperm.xlu1 %2794, %v3361_v3   ;;  %v3382_v24 = vadd.f32 %v3326_v6, %v311_v23  ;;  %v316_v23 = vmul.f32 -0.5, %v3228_v33 }
 0x106   :  { %4812 = vst [vmem:[#allocation16_spill] sm:$0xff] %v3382_v24  ;;  %v3404_v55 = vadd.f32 %v3282_v60, %v316_v23 }
 0x108   :  { %653 = vperm.xlu0 %2793, %v3366_v19   ;;  %656 = vperm.xlu1 %2794, %v3369_v9   ;;  %v314_v19 = vmul.f32 -0.5, %v3224_v31  ;;  %4817 = vst [vmem:[#allocation21_spill] sm:$0xff] %v3404_v55 }
 0x10a   :  { %v3394_v14 = vadd.f32 %v3272_v10, %v314_v19  ;;  %v3413_v33 = vadd.f32 %v3284_v20, %v314_v19 }
 0x10c   :  { %659 = vperm.xlu0 %2793, %v3374_v26   ;;  %662 = vperm.xlu1 %2794, %v3377_v25   ;;  %4815 = vst [vmem:[#allocation19_spill] sm:$0xff] %v3394_v14  ;;  %v315_v26 = vmul.f32 -0.5, %v3222_v30  ;;  %v3410_v30 = vadd.f32 %v3290_v62, %v317_v61  ;;  %4819 = vst [vmem:[#allocation23_spill] sm:$0xff] %v3413_v33 }
 0x10e   :  { %v3401_v31 = vadd.f32 %v3270_v56, %v315_v26  ;;  %4818 = vst [vmem:[#allocation22_spill] sm:$0xff] %v3410_v30 }
 0x110   :  { %665 = vperm.xlu0 %2793, %v3382_v24   ;;  %668 = vperm.xlu1 %2794, %v3385_v17   ;;  %4816 = vst [vmem:[#allocation20_spill] sm:$0xff] %v3401_v31  ;;  %v3421_v24 = vadd.f32 %v3292_v63, %v316_v23 }
 0x112   :  { %4821 = vst [vmem:[#allocation25_spill] sm:$0xff] %v3421_v24 }
 0x114   :  { %671 = vperm.xlu0 %2793, %v3391_v57   ;;  %674 = vperm.xlu1 %2794, %v3394_v14   ;;  %v3418_v57 = vadd.f32 %v3302_v21, %v315_v26 }
 0x116   :  { %4820 = vst [vmem:[#allocation24_spill] sm:$0xff] %v3418_v57 }
 0x118   :  { %677 = vperm.xlu0 %2793, %v3401_v31   ;;  %680 = vperm.xlu1 %2794, %v3404_v55   ;;  %v3429_v31 = vadd.f32 %v3304_v29, %v314_v19 }
 0x11a   :  { %4823 = vst [vmem:[#allocation27_spill] sm:$0xff] %v3429_v31 }
 0x11c   :  { %683 = vperm.xlu0 %2793, %v3410_v30   ;;  %686 = vperm.xlu1 %2794, %v3413_v33   ;;  %v3434_v30 = vadd.f32 %v3326_v6, %v315_v26  ;;  %v3437_v33 = vadd.f32 %v3322_v5, %v316_v23  ;;  %v320_v26 = vmul.f32 -0.5, %v3236_v37 }
 0x11e   :  { %4824 = vst [vmem:[#allocation28_spill] sm:$0xff] %v3434_v30  ;;  %4825 = vst [vmem:[#allocation29_spill] sm:$0xff] %v3437_v33  ;;  %v3456_v23 = vadd.f32 %v3282_v60, %v320_v26 }
 0x120   :  { %689 = vperm.xlu0 %2793, %v3418_v57   ;;  %692 = vperm.xlu1 %2794, %v3421_v24   ;;  %v318_v57 = vmul.f32 -0.5, %v3232_v35  ;;  %v3443_v24 = vadd.f32 %v3336_v18, %v317_v61  ;;  %4829 = vst [vmem:[#allocation33_spill] sm:$0xff] %v3456_v23  ;;  %v321_v61 = vmul.f32 -0.5, %v3234_v36 }
 0x122   :  { %4826 = vst [vmem:[#allocation30_spill] sm:$0xff] %v3443_v24  ;;  %v3446_v19 = vadd.f32 %v3272_v10, %v318_v57  ;;  %v3465_v37 = vadd.f32 %v3284_v20, %v318_v57  ;;  %v3478_v36 = vadd.f32 %v3314_v2, %v321_v61 }
 0x124   :  { %695 = vperm.xlu0 %2793, %v3426_v32   ;;  %698 = vperm.xlu1 %2794, %v3429_v31   ;;  %4827 = vst [vmem:[#allocation31_spill] sm:$0xff] %v3446_v19  ;;  %v319_v32 = vmul.f32 -0.5, %v3230_v34  ;;  %v3462_v34 = vadd.f32 %v3290_v62, %v321_v61  ;;  %4831 = vst [vmem:[#allocation35_spill] sm:$0xff] %v3465_v37 }
 0x125   :  { %4834 = vst [vmem:[#allocation38_spill] sm:$0xff] %v3478_v36 }
 0x126   :  { %v3453_v35 = vadd.f32 %v3270_v56, %v319_v32  ;;  %4830 = vst [vmem:[#allocation34_spill] sm:$0xff] %v3462_v34 }
 0x128   :  { %701 = vperm.xlu0 %2793, %v3434_v30   ;;  %704 = vperm.xlu1 %2794, %v3437_v33   ;;  %4828 = vst [vmem:[#allocation32_spill] sm:$0xff] %v3453_v35  ;;  %v3473_v30 = vadd.f32 %v3292_v63, %v320_v26  ;;  %v333_v33 = vmul.f32 -0.5, %v3258_v48 }
 0x12a   :  { %4833 = vst [vmem:[#allocation37_spill] sm:$0xff] %v3473_v30  ;;  %v3664_v55 = vadd.f32 %v3314_v2, %v333_v33 }
 0x12c   :  { %707 = vperm.xlu0 %2793, %v3443_v24   ;;  %710 = vperm.xlu1 %2794, %v3446_v19   ;;  %v3470_v24 = vadd.f32 %v3302_v21, %v319_v32  ;;  %v332_v19 = vmul.f32 -0.5, %v3260_v49  ;;  %4869 = vst [vmem:[#allocation73_spill] sm:$0xff] %v3664_v55 }
 0x12e   :  { %4832 = vst [vmem:[#allocation36_spill] sm:$0xff] %v3470_v24 }
 0x130   :  { %713 = vperm.xlu0 %2793, %v3453_v35   ;;  %716 = vperm.xlu1 %2794, %v3456_v23   ;;  %v3481_v35 = vadd.f32 %v3304_v29, %v318_v57  ;;  %v331_v23 = vmul.f32 -0.5, %v3254_v46  ;;  %v3640_v46 = vadd.f32 %v3290_v62, %v333_v33 }
 0x132   :  { %4835 = vst [vmem:[#allocation39_spill] sm:$0xff] %v3481_v35  ;;  %4865 = vst [vmem:[#allocation69_spill] sm:$0xff] %v3640_v46  ;;  %v3652_v48 = vadd.f32 %v3302_v21, %v331_v23  ;;  %v3676_v17 = vadd.f32 %v3326_v6, %v331_v23 }
 0x134   :  { %719 = vperm.xlu0 %2793, %v3462_v34   ;;  %722 = vperm.xlu1 %2794, %v3465_v37   ;;  %v3486_v34 = vadd.f32 %v3326_v6, %v319_v32  ;;  %v3489_v37 = vadd.f32 %v3322_v5, %v320_v26  ;;  %v324_v32 = vmul.f32 -0.5, %v3244_v41  ;;  %4867 = vst [vmem:[#allocation71_spill] sm:$0xff] %v3652_v48  ;;  %4871 = vst [vmem:[#allocation75_spill] sm:$0xff] %v3676_v17 }
 0x136   :  { %4836 = vst [vmem:[#allocation40_spill] sm:$0xff] %v3486_v34  ;;  %4837 = vst [vmem:[#allocation41_spill] sm:$0xff] %v3489_v37  ;;  %v3508_v26 = vadd.f32 %v3282_v60, %v324_v32 }
 0x138   :  { %725 = vperm.xlu0 %2793, %v3470_v24   ;;  %728 = vperm.xlu1 %2794, %v3473_v30   ;;  %v322_v24 = vmul.f32 -0.5, %v3240_v39  ;;  %v3495_v30 = vadd.f32 %v3336_v18, %v321_v61  ;;  %4840 = vst [vmem:[#allocation44_spill] sm:$0xff] %v3508_v26  ;;  %v325_v61 = vmul.f32 -0.5, %v3242_v40 }
 0x13a   :  { %4838 = vst [vmem:[#allocation42_spill] sm:$0xff] %v3495_v30  ;;  %v3498_v57 = vadd.f32 %v3272_v10, %v322_v24  ;;  %v3517_v41 = vadd.f32 %v3284_v20, %v322_v24  ;;  %v3530_v40 = vadd.f32 %v3314_v2, %v325_v61 }
 0x13c   :  { %731 = vperm.xlu0 %2793, %v3478_v36   ;;  %734 = vperm.xlu1 %2794, %v3481_v35   ;;  %v323_v36 = vmul.f32 -0.5, %v3238_v38  ;;  %v3514_v38 = vadd.f32 %v3290_v62, %v325_v61  ;;  %4842 = vst [vmem:[#allocation46_spill] sm:$0xff] %v3517_v41  ;;  %4845 = vst [vmem:[#allocation49_spill] sm:$0xff] %v3530_v40 }
 0x13e   :  { %v3505_v39 = vadd.f32 %v3270_v56, %v323_v36  ;;  %4841 = vst [vmem:[#allocation45_spill] sm:$0xff] %v3514_v38 }
 0x140   :  { %737 = vperm.xlu0 %2793, %v3486_v34   ;;  %740 = vperm.xlu1 %2794, %v3489_v37   ;;  %4839 = vst [vmem:[#allocation43_spill] sm:$0xff] %v3505_v39  ;;  %v3525_v34 = vadd.f32 %v3292_v63, %v324_v32  ;;  %v3541_v37 = vadd.f32 %v3322_v5, %v324_v32 }
 0x142   :  { %4844 = vst [vmem:[#allocation48_spill] sm:$0xff] %v3525_v34  ;;  %4848 = vst [vmem:[#allocation52_spill] sm:$0xff] %v3541_v37 }
 0x144   :  { %743 = vperm.xlu0 %2793, %v3495_v30   ;;  %746 = vperm.xlu1 %2794, %v3498_v57   ;;  %v3522_v30 = vadd.f32 %v3302_v21, %v323_v36 }
 0x146   :  { %4843 = vst [vmem:[#allocation47_spill] sm:$0xff] %v3522_v30 }
 0x148   :  { %749 = vperm.xlu0 %2793, %v3505_v39   ;;  %752 = vperm.xlu1 %2794, %v3508_v26   ;;  %v3533_v39 = vadd.f32 %v3304_v29, %v322_v24 }
 0x14a   :  { %4846 = vst [vmem:[#allocation50_spill] sm:$0xff] %v3533_v39 }
 0x14c   :  { %755 = vperm.xlu0 %2793, %v3514_v38   ;;  %758 = vperm.xlu1 %2794, %v3517_v41   ;;  %v3538_v38 = vadd.f32 %v3326_v6, %v323_v36  ;;  %v328_v36 = vmul.f32 -0.5, %v3252_v45 }
 0x14e   :  { %4847 = vst [vmem:[#allocation51_spill] sm:$0xff] %v3538_v38  ;;  %v3560_v32 = vadd.f32 %v3282_v60, %v328_v36 }
 0x150   :  { %761 = vperm.xlu0 %2793, %v3522_v30   ;;  %764 = vperm.xlu1 %2794, %v3525_v34   ;;  %v326_v30 = vmul.f32 -0.5, %v3248_v43  ;;  %v3547_v34 = vadd.f32 %v3336_v18, %v325_v61  ;;  %4852 = vst [vmem:[#allocation56_spill] sm:$0xff] %v3560_v32  ;;  %v329_v61 = vmul.f32 -0.5, %v3250_v44  ;;  %v3579_v44 = vadd.f32 %v3292_v63, %v328_v36 }
 0x152   :  { %4849 = vst [vmem:[#allocation53_spill] sm:$0xff] %v3547_v34  ;;  %v3550_v24 = vadd.f32 %v3272_v10, %v326_v30  ;;  %v3569_v45 = vadd.f32 %v3284_v20, %v326_v30  ;;  %4856 = vst [vmem:[#allocation60_spill] sm:$0xff] %v3579_v44 }
 0x154   :  { %767 = vperm.xlu0 %2793, %v3530_v40   ;;  %770 = vperm.xlu1 %2794, %v3533_v39   ;;  %4850 = vst [vmem:[#allocation54_spill] sm:$0xff] %v3550_v24  ;;  %v327_v40 = vmul.f32 -0.5, %v3246_v42  ;;  %v3566_v42 = vadd.f32 %v3290_v62, %v329_v61  ;;  %4854 = vst [vmem:[#allocation58_spill] sm:$0xff] %v3569_v45 }
 0x156   :  { %v3557_v43 = vadd.f32 %v3270_v56, %v327_v40  ;;  %4853 = vst [vmem:[#allocation57_spill] sm:$0xff] %v3566_v42  ;;  %v3600_v39 = vadd.f32 %v3326_v6, %v327_v40 }
 0x158   :  { %773 = vperm.xlu0 %2793, %v3538_v38   ;;  %776 = vperm.xlu1 %2794, %v3541_v37   ;;  %4851 = vst [vmem:[#allocation55_spill] sm:$0xff] %v3557_v43  ;;  %v3576_v38 = vadd.f32 %v3302_v21, %v327_v40  ;;  %4859 = vst [vmem:[#allocation63_spill] sm:$0xff] %v3600_v39 }
 0x15a   :  { %4855 = vst [vmem:[#allocation59_spill] sm:$0xff] %v3576_v38 }
 0x15c   :  { %779 = vperm.xlu0 %2793, %v3547_v34   ;;  %782 = vperm.xlu1 %2794, %v3550_v24   ;;  %v3588_v24 = vadd.f32 %v3314_v2, %v329_v61 }
 0x15e   :  { %4857 = vst [vmem:[#allocation61_spill] sm:$0xff] %v3588_v24 }
 0x160   :  { %785 = vperm.xlu0 %2793, %v3557_v43   ;;  %788 = vperm.xlu1 %2794, %v3560_v32  }
 0x163   :  { %v3571_v34 = vpop.permute.xlu1 %605  ;;  %v3581_v43 = vpop.permute.xlu0 %602 }
 0x164   :  { %791 = vperm.xlu0 %2793, %v3566_v42   ;;  %794 = vperm.xlu1 %2794, %v3569_v45   ;;  %v3591_v42 = vadd.f32 %v3304_v29, %v326_v30  ;;  %v330_v30 = vmul.f32 -0.5, %v3256_v47  ;;  %v3627_v47 = vadd.f32 %v3270_v56, %v331_v23  ;;  %v335_v23 = vmul.f32 -0.5, %v3262_v50 }
 0x166   :  { %4858 = vst [vmem:[#allocation62_spill] sm:$0xff] %v3591_v42  ;;  %4863 = vst [vmem:[#allocation67_spill] sm:$0xff] %v3627_v47  ;;  %v3643_v49 = vadd.f32 %v3284_v20, %v330_v30  ;;  %v3714_v50 = vadd.f32 %v3302_v21, %v335_v23 }
 0x167   :  { %v3583_v32 = vpop.permute.xlu1 %608 }
 0x168   :  { %797 = vperm.xlu0 %2793, %v3576_v38   ;;  %800 = vperm.xlu1 %2794, %v3579_v44   ;;  %v3603_v38 = vadd.f32 %v3322_v5, %v328_v36  ;;  %4866 = vst [vmem:[#allocation70_spill] sm:$0xff] %v3643_v49  ;;  %4876 = vst [vmem:[#allocation80_spill] sm:$0xff] %v3714_v50 }
 0x16a   :  { %4860 = vst [vmem:[#allocation64_spill] sm:$0xff] %v3603_v38 }
 0x16b   :  { %v3593_v45 = vpop.permute.xlu1 %614  ;;  %v3595_v37 = vpop.permute.xlu0 %611 }
 0x16c   :  { %803 = vperm.xlu0 %2793, %v3588_v24   ;;  %806 = vperm.xlu1 %2794, %v3591_v42   ;;  %v3613_v24 = vadd.f32 %v3336_v18, %v329_v61  ;;  %v3616_v42 = vadd.f32 %v3272_v10, %v330_v30  ;;  %v3630_v61 = vadd.f32 %v3282_v60, %v332_v19 }
 0x16e   :  { %4861 = vst [vmem:[#allocation65_spill] sm:$0xff] %v3613_v24  ;;  %4862 = vst [vmem:[#allocation66_spill] sm:$0xff] %v3616_v42 }
 0x16f   :  { %v3605_v44 = vpop.permute.xlu1 %620  ;;  %v3607_v35 = vpop.permute.xlu0 %617  ;;  %4864 = vst [vmem:[#allocation68_spill] sm:$0xff] %v3630_v61 }
 0x170   :  { %809 = vperm.xlu0 %2793, %v3600_v39   ;;  %812 = vperm.xlu1 %2794, %v3603_v38   ;;  %v923_v54 = vrot.slane %v3607_v35, %v3040_v12  ;;  %v928_v41 = vrot.slane %v3605_v44, %v3043_v13  ;;  %v906_v44 = vrot.slane %v3583_v32, %v3043_v13 }
 0x173   :  { %v3618_v40 = vpop.permute.xlu1 %626  ;;  %v3620_v36 = vpop.permute.xlu0 %623 }
 0x174   :  { %815 = vperm.xlu0 %2793, %v3613_v24   ;;  %818 = vperm.xlu1 %2794, %v3616_v42   ;;  %v938_v35 = vrot.slane %v3618_v40, %v3034_v7 }
 0x177   :  { %v3632_v39 = vpop.permute.xlu1 %632  ;;  %v3634_v38 = vpop.permute.xlu0 %629 }
 0x178   :  { %821 = vperm.xlu0 %2793, %v3627_v47   ;;  %824 = vperm.xlu1 %2794, %v3630_v61   ;;  %v3655_v47 = vadd.f32 %v3292_v63, %v332_v19  ;;  %v942_v21 = vrot.slane %v3634_v38, %v3040_v12  ;;  %v894_v38 = vrot.slane %v3581_v43, %v3034_v7 }
 0x17a   :  { %4868 = vst [vmem:[#allocation72_spill] sm:$0xff] %v3655_v47  ;;  %v943_v40 = vsel %vm900_vm1, %v942_v21, %v938_v35 }
 0x17b   :  { %v3645_v24 = vpop.permute.xlu1 %638  ;;  %v3647_v42 = vpop.permute.xlu0 %635 }
 0x17c   :  { %827 = vperm.xlu0 %2793, %v3640_v46   ;;  %830 = vperm.xlu1 %2794, %v3643_v49   ;;  %v3667_v46 = vadd.f32 %v3304_v29, %v330_v30  ;;  %v3688_v30 = vadd.f32 %v3336_v18, %v333_v33 }
 0x17e   :  { %4870 = vst [vmem:[#allocation74_spill] sm:$0xff] %v3667_v46  ;;  %4873 = vst [vmem:[#allocation77_spill] sm:$0xff] %v3688_v30 }
 0x17f   :  { %v3657_v61 = vpop.permute.xlu1 %644  ;;  %v3659_v31 = vpop.permute.xlu0 %641 }
 0x180   :  { %833 = vperm.xlu0 %2793, %v3652_v48   ;;  %836 = vperm.xlu1 %2794, %v3655_v47   ;;  %v3679_v48 = vadd.f32 %v3322_v5, %v332_v19  ;;  %v3697_v19 = vadd.f32 %v3270_v56, %v335_v23 }
 0x182   :  { %4872 = vst [vmem:[#allocation76_spill] sm:$0xff] %v3679_v48  ;;  %4874 = vst [vmem:[#allocation78_spill] sm:$0xff] %v3697_v19 }
 0x183   :  { %v3669_v49 = vpop.permute.xlu1 %650  ;;  %v3671_v14 = vpop.permute.xlu0 %647 }
 0x184   :  { %839 = vperm.xlu0 %2793, %v3664_v55   ;;  %842 = vperm.xlu1 %2794, %v3667_v46  }
 0x187   :  { %v3681_v47 = vpop.permute.xlu1 %656  ;;  %v3683_v25 = vpop.permute.xlu0 %653 }
 0x188   :  { %845 = vperm.xlu0 %2793, %v3676_v17   ;;  %848 = vperm.xlu1 %2794, %v3679_v48   ;;  %v337_v48 = vmul.f32 -0.5, %v3266_v52 }
 0x18a   :  { %v3706_v33 = vadd.f32 %v3290_v62, %v337_v48  ;;  %v3722_v52 = vadd.f32 %v3314_v2, %v337_v48  ;;  %v899_v2 = vrot.slane %v3571_v34, %v3040_v12  ;;  %v947_v34 = vrot.slane %v3632_v39, %v3043_v13 }
 0x18b   :  { %v3690_v55 = vpop.permute.xlu1 %662  ;;  %v3692_v46 = vpop.permute.xlu0 %659  ;;  %v3764_v43 = vadd.f32 %v3336_v18, %v337_v48 }
 0x18c   :  { %851 = vperm.xlu0 %2793, %v3688_v30   ;;  %4875 = vst [vmem:[#allocation79_spill] sm:$0xff] %v3706_v33  ;;  %4877 = vst [vmem:[#allocation81_spill] sm:$0xff] %v3722_v52  ;;  %v901_v32 = vsel %vm900_vm1, %v899_v2, %v894_v38 }
 0x18f   :  { %v3699_v9 = vpop.permute.xlu1 %668  ;;  %v3701_v3 = vpop.permute.xlu0 %665 }
 0x190   :  { %857 = vperm.xlu0 %2793, %v3697_v19  }
 0x193   :  { %v3708_v17 = vpop.permute.xlu1 %674  ;;  %v3710_v59 = vpop.permute.xlu0 %671 }
 0x194   :  { %863 = vperm.xlu0 %2793, %v3706_v33   ;;  %v919_v33 = vrot.slane %v3593_v45, %v3034_v7  ;;  %v933_v45 = vrot.slane %v3620_v36, %v3051_v16 }
 0x197   :  { %v3716_v56 = vpop.permute.xlu1 %680  ;;  %v3718_v30 = vpop.permute.xlu0 %677 }
 0x198   :  { %869 = vperm.xlu0 %2793, %v3714_v50   ;;  %v3736_v50 = vadd.f32 %v3326_v6, %v335_v23  ;;  %v924_v6 = vsel %vm900_vm1, %v923_v54, %v919_v33  ;;  %v952_v23 = vrot.slane %v3647_v42, %v3051_v16  ;;  %v913_v54 = vrot.slane %v3595_v37, %v3051_v16 }
 0x199   :  { %v929_v39 = vsel %vm907_vm2, %v928_v41, %v924_v6  ;;  %v948_v42 = vsel %vm907_vm2, %v947_v34, %v943_v40  ;;  %v908_v37 = vsel %vm907_vm2, %v906_v44, %v901_v32  ;;  %v999_v32 = vrot.slane %v3701_v3, %v3040_v12 }
 0x19a   :  { %v934_v21 = vsel %vm914_vm3, %v933_v45, %v929_v39  ;;  %v953_v18 = vsel %vm914_vm3, %v952_v23, %v948_v42  ;;  %v915_v41 = vsel %vm914_vm3, %v913_v54, %v908_v37  ;;  %v961_v23 = vrot.slane %v3659_v31, %v3040_v12 }
 0x19b   :  { %v3724_v62 = vpop.permute.xlu1 %686  ;;  %v3726_v19 = vpop.permute.xlu0 %683  ;;  %v1354_v6 = vsel %vm1353_vm4, %v934_v21, %v915_v41  ;;  %v980_v54 = vrot.slane %v3683_v25, %v3040_v12  ;;  %v957_v39 = vrot.slane %v3645_v24, %v3034_v7  ;;  %v966_v21 = vrot.slane %v3657_v61, %v3043_v13 }
 0x19c   :  { %875 = vperm.xlu0 %2793, %v3722_v52   ;;  %v1356_v2 = vsel %vm1355_vm5, %v953_v18, %v1354_v6  ;;  %v976_v42 = vrot.slane %v3669_v49, %v3034_v7  ;;  %v971_v25 = vrot.slane %v3671_v14, %v3051_v16  ;;  %v985_v24 = vrot.slane %v3681_v47, %v3043_v13 }
 0x19d   :  { %v1380_v34 = vsel %vm1379_vm6, %v1356_v2, -inf  ;;  %v962_v31 = vsel %vm900_vm1, %v961_v23, %v957_v39  ;;  %v995_v3 = vrot.slane %v3690_v55, %v3034_v7  ;;  %v990_v61 = vrot.slane %v3692_v46, %v3051_v16 }
 0x19e   :  { %v981_v41 = vsel %vm900_vm1, %v980_v54, %v976_v42  ;;  %v1004_v49 = vrot.slane %v3699_v9, %v3043_v13  ;;  %v967_v14 = vsel %vm907_vm2, %v966_v21, %v962_v31  ;;  %v1009_v47 = vrot.slane %v3710_v59, %v3051_v16 }
 0x19f   :  { %v3744_v52 = vpop.permute.xlu1 %692  ;;  %v3746_v26 = vpop.permute.xlu0 %689  ;;  %v1000_v6 = vsel %vm900_vm1, %v999_v32, %v995_v3  ;;  %v1018_v55 = vrot.slane %v3718_v30, %v3040_v12  ;;  %v972_v46 = vsel %vm914_vm3, %v971_v25, %v967_v14  ;;  %v986_v54 = vsel %vm907_vm2, %v985_v24, %v981_v41 }
 0x1a0   :  { %881 = vperm.xlu0 %2793, %v3736_v50   ;;  %v1037_v2 = vrot.slane %v3746_v26, %v3040_v12  ;;  %v1033_v9 = vrot.slane %v3724_v62, %v3034_v7  ;;  %v991_v26 = vsel %vm914_vm3, %v990_v61, %v986_v54  ;;  %v1014_v32 = vrot.slane %v3708_v17, %v3034_v7 }
 0x1a1   :  { %v1042_v59 = vrot.slane %v3744_v52, %v3043_v13  ;;  %v1005_v30 = vsel %vm907_vm2, %v1004_v49, %v1000_v6  ;;  %v1023_v21 = vrot.slane %v3716_v56, %v3043_v13 }
 0x1a2   :  { %v1038_v42 = vsel %vm900_vm1, %v1037_v2, %v1033_v9  ;;  %v1019_v31 = vsel %vm900_vm1, %v1018_v55, %v1014_v32  ;;  %v1010_v3 = vsel %vm914_vm3, %v1009_v47, %v1005_v30 }
 0x1a3   :  { %v3767_v36 = vpop.permute.xlu1 %698  ;;  %v3769_v33 = vpop.permute.xlu0 %695  ;;  %v1043_v61 = vsel %vm907_vm2, %v1042_v59, %v1038_v42  ;;  %v1024_v6 = vsel %vm907_vm2, %v1023_v21, %v1019_v31 }
 0x1a4   :  { %887 = vperm.xlu0 %2793, %v3764_v43   ;;  %v1052_v62 = vrot.slane %v3767_v36, %v3034_v7  ;;  %v1357_v36 = vsel %vm1353_vm4, %v991_v26, %v972_v46 }
 0x1a7   :  { %v3778_v48 = vpop.permute.xlu1 %704  ;;  %v702_v35 = vpop.permute.xlu0 %701 }
 0x1a8   :  { %v1056_v39 = vrot.slane %v702_v35, %v3040_v12  ;;  %v1047_v35 = vrot.slane %v3769_v33, %v3051_v16  ;;  %v1061_v17 = vrot.slane %v3778_v48, %v3043_v13  ;;  %v1028_v33 = vrot.slane %v3726_v19, %v3051_v16 }
 0x1aa   :  { %v1057_v56 = vsel %vm900_vm1, %v1056_v39, %v1052_v62  ;;  %v1048_v2 = vsel %vm914_vm3, %v1047_v35, %v1043_v61  ;;  %v1029_v39 = vsel %vm914_vm3, %v1028_v33, %v1024_v6 }
 0x1ab   :  { %v3782_v38 = vpop.permute.xlu1 %710  ;;  %v3784_v45 = vpop.permute.xlu0 %707  ;;  %v1359_v21 = vsel %vm1353_vm4, %v1048_v2, %v1029_v39 }
 0x1ac   :  { %1381 = vmax.xlane.f32.xlu1 %v1380_v34  ;;  %v1066_v41 = vrot.slane %v3784_v45, %v3051_v16  ;;  %v1358_v45 = vsel %vm1355_vm5, %v1010_v3, %v1357_v36  ;;  %v1071_v47 = vrot.slane %v3782_v38, %v3034_v7 }
 0x1af   :  { %v3787_v44 = vpop.permute.xlu1 %716  ;;  %v3789_v40 = vpop.permute.xlu0 %713 }
 0x1b0   :  { %v1075_v48 = vrot.slane %v3789_v40, %v3040_v12  ;;  %v1062_v40 = vsel %vm907_vm2, %v1061_v17, %v1057_v56 }
 0x1b1   :  { %v1067_v9 = vsel %vm914_vm3, %v1066_v41, %v1062_v40 }
 0x1b2   :  { %v1076_v38 = vsel %vm900_vm1, %v1075_v48, %v1071_v47  ;;  %v1360_v31 = vsel %vm1355_vm5, %v1067_v9, %v1359_v21 }
 0x1b3   :  { %v723_v37 = vpop.permute.xlu1 %722  ;;  %v3803_v18 = vpop.permute.xlu0 %719 }
 0x1b4   :  { %v1090_v49 = vrot.slane %v723_v37, %v3034_v7  ;;  %v1080_v37 = vrot.slane %v3787_v44, %v3043_v13  ;;  %v1085_v26 = vrot.slane %v3803_v18, %v3051_v16  ;;  %v1383_v44 = vsel %vm1379_vm6, %v1358_v45, -inf }
 0x1b6   :  { %v1081_v17 = vsel %vm907_vm2, %v1080_v37, %v1076_v38 }
 0x1b7   :  { %v729_v34 = vpop.permute.xlu1 %728  ;;  %v726_v23 = vpop.permute.xlu0 %725 }
 0x1b8   :  { %v1094_v52 = vrot.slane %v726_v23, %v3040_v12  ;;  %v1099_v14 = vrot.slane %v729_v34, %v3043_v13 }
 0x1ba   :  { %v1095_v19 = vsel %vm900_vm1, %v1094_v52, %v1090_v49  ;;  %v1086_v52 = vsel %vm914_vm3, %v1085_v26, %v1081_v17 }
 0x1bb   :  { %v735_v25 = vpop.permute.xlu1 %734  ;;  %v732_v24 = vpop.permute.xlu0 %731  ;;  %v1100_v59 = vsel %vm907_vm2, %v1099_v14, %v1095_v19 }
 0x1bc   :  { %v1104_v55 = vrot.slane %v732_v24, %v3051_v16  ;;  %v1109_v54 = vrot.slane %v735_v25, %v3034_v7  ;;  %v1386_v24 = vsel %vm1379_vm6, %v1360_v31, -inf }
 0x1be   :  { %v1105_v42 = vsel %vm914_vm3, %v1104_v55, %v1100_v59 }
 0x1bf   :  { %v741_v23 = vpop.permute.xlu1 %740  ;;  %v738_v46 = vpop.permute.xlu0 %737  ;;  %v1361_v56 = vsel %vm1353_vm4, %v1105_v42, %v1086_v52 }
 0x1c0   :  { %v1113_v34 = vrot.slane %v738_v46, %v3040_v12  ;;  %v1118_v32 = vrot.slane %v741_v23, %v3043_v13 }
 0x1c2   :  { %v1114_v30 = vsel %vm900_vm1, %v1113_v34, %v1109_v54 }
 0x1c3   :  { %v747_v62 = vpop.permute.xlu1 %746  ;;  %1384 = vmax.xlane.f32.xlu0 %v1383_v44  ;;  %v744_v35 = vpop.permute.xlu0 %743  ;;  %v1119_v25 = vsel %vm907_vm2, %v1118_v32, %v1114_v30 }
 0x1c4   :  { %v1123_v18 = vrot.slane %v744_v35, %v3051_v16  ;;  %v1128_v46 = vrot.slane %v747_v62, %v3034_v7 }
 0x1c6   :  { %v1124_v3 = vsel %vm914_vm3, %v1123_v18, %v1119_v25 }
 0x1c7   :  { %v753_v41 = vpop.permute.xlu1 %752  ;;  %1387 = vmax.xlane.f32.xlu0 %v1386_v24  ;;  %v750_v36 = vpop.permute.xlu0 %749  ;;  %v1362_v33 = vsel %vm1355_vm5, %v1124_v3, %v1361_v56 }
 0x1c8   :  { %v1389_v61 = vsel %vm1379_vm6, %v1362_v33, -inf  ;;  %v1132_v19 = vrot.slane %v750_v36, %v3040_v12  ;;  %v1137_v9 = vrot.slane %v753_v41, %v3043_v13 }
 0x1ca   :  { %v1133_v26 = vsel %vm900_vm1, %v1132_v19, %v1128_v46 }
 0x1cb   :  { %v759_v48 = vpop.permute.xlu1 %758  ;;  %1390 = vmax.xlane.f32.xlu0 %v1389_v61  ;;  %v756_v49 = vpop.permute.xlu0 %755  ;;  %v1138_v35 = vsel %vm907_vm2, %v1137_v9, %v1133_v26 }
 0x1cc   :  { %v1147_v55 = vrot.slane %v759_v48, %v3034_v7  ;;  %v1142_v32 = vrot.slane %v756_v49, %v3051_v16 }
 0x1ce   :  { %v1143_v17 = vsel %vm914_vm3, %v1142_v32, %v1138_v35 }
 0x1cf   :  { %v765_v6 = vpop.permute.xlu1 %764  ;;  %v762_v2 = vpop.permute.xlu0 %761 }
 0x1d0   :  { %v1151_v14 = vrot.slane %v762_v2, %v3040_v12  ;;  %v1156_v23 = vrot.slane %v765_v6, %v3043_v13 }
 0x1d2   :  { %v1152_v40 = vsel %vm900_vm1, %v1151_v14, %v1147_v55 }
 0x1d3   :  { %v771_v45 = vpop.permute.xlu1 %770  ;;  %v768_v47 = vpop.permute.xlu0 %767  ;;  %v1157_v30 = vsel %vm907_vm2, %v1156_v23, %v1152_v40 }
 0x1d4   :  { %v1161_v37 = vrot.slane %v768_v47, %v3051_v16  ;;  %v1166_v39 = vrot.slane %v771_v45, %v3034_v7 }
 0x1d6   :  { %v1162_v21 = vsel %vm914_vm3, %v1161_v37, %v1157_v30 }
 0x1d7   :  { %v777_v54 = vpop.permute.xlu1 %776  ;;  %v774_v34 = vpop.permute.xlu0 %773  ;;  %v1363_v25 = vsel %vm1353_vm4, %v1162_v21, %v1143_v17 }
 0x1d8   :  { %v1170_v38 = vrot.slane %v774_v34, %v3040_v12  ;;  %v1175_v59 = vrot.slane %v777_v54, %v3043_v13 }
 0x1da   :  { %v1171_v44 = vsel %vm900_vm1, %v1170_v38, %v1166_v39 }
 0x1db   :  { %v783_v42 = vpop.permute.xlu1 %782  ;;  %v780_v62 = vpop.permute.xlu0 %779  ;;  %v1176_v18 = vsel %vm907_vm2, %v1175_v59, %v1171_v44 }
 0x1dc   :  { %v1180_v31 = vrot.slane %v780_v62, %v3051_v16  ;;  %v1185_v19 = vrot.slane %v783_v42, %v3034_v7 }
 0x1de   :  { %v1181_v52 = vsel %vm914_vm3, %v1180_v31, %v1176_v18 }
 0x1df   :  { %v789_v24 = vpop.permute.xlu1 %788  ;;  %v786_v3 = vpop.permute.xlu0 %785  ;;  %v1364_v56 = vsel %vm1355_vm5, %v1181_v52, %v1363_v25 }
 0x1e0   :  { %v1392_v41 = vsel %vm1379_vm6, %v1364_v56, -inf  ;;  %v1189_v14 = vrot.slane %v786_v3, %v3040_v12  ;;  %v1194_v37 = vrot.slane %v789_v24, %v3043_v13 }
 0x1e1   :  { %1393 = vmax.xlane.f32.xlu1 %v1392_v41 }
 0x1e2   :  { %v1190_v9 = vsel %vm900_vm1, %v1189_v14, %v1185_v19 }
 0x1e3   :  { %v795_v36 = vpop.permute.xlu1 %794  ;;  %v792_v33 = vpop.permute.xlu0 %791  ;;  %v1195_v21 = vsel %vm907_vm2, %v1194_v37, %v1190_v9 }
 0x1e4   :  { %v1204_v45 = vrot.slane %v795_v36, %v3034_v7  ;;  %v1199_v39 = vrot.slane %v792_v33, %v3051_v16 }
 0x1e6   :  { %v1200_v62 = vsel %vm914_vm3, %v1199_v39, %v1195_v21 }
 0x1e7   :  { %v801_v61 = vpop.permute.xlu1 %800  ;;  %v798_v48 = vpop.permute.xlu0 %797 }
 0x1e8   :  { %v1208_v49 = vrot.slane %v798_v48, %v3040_v12  ;;  %v1213_v47 = vrot.slane %v801_v61, %v3043_v13 }
 0x1ea   :  { %v1209_v55 = vsel %vm900_vm1, %v1208_v49, %v1204_v45 }
 0x1eb   :  { %v807_v6 = vpop.permute.xlu1 %806  ;;  %v804_v2 = vpop.permute.xlu0 %803  ;;  %v1214_v26 = vsel %vm907_vm2, %v1213_v47, %v1209_v55 }
 0x1ec   :  { %v1218_v23 = vrot.slane %v804_v2, %v3051_v16  ;;  %v1223_v54 = vrot.slane %v807_v6, %v3034_v7 }
 0x1ee   :  { %v1219_v59 = vsel %vm914_vm3, %v1218_v23, %v1214_v26 }
 0x1ef   :  { %v813_v46 = vpop.permute.xlu1 %812  ;;  %v810_v40 = vpop.permute.xlu0 %809  ;;  %v1365_v17 = vsel %vm1353_vm4, %v1219_v59, %v1200_v62 }
 0x1f0   :  { %v1227_v34 = vrot.slane %v810_v40, %v3040_v12  ;;  %v1232_v38 = vrot.slane %v813_v46, %v3043_v13 }
 0x1f2   :  { %v1228_v32 = vsel %vm900_vm1, %v1227_v34, %v1223_v54 }
 0x1f3   :  { %v819_v30 = vpop.permute.xlu1 %818  ;;  %v816_v44 = vpop.permute.xlu0 %815  ;;  %v1233_v35 = vsel %vm907_vm2, %v1232_v38, %v1228_v32 }
 0x1f4   :  { %v1237_v42 = vrot.slane %v816_v44, %v3051_v16  ;;  %v1242_v14 = vrot.slane %v819_v30, %v3034_v7 }
 0x1f6   :  { %v1238_v31 = vsel %vm914_vm3, %v1237_v42, %v1233_v35 }
 0x1f7   :  { %v825_v18 = vpop.permute.xlu1 %824  ;;  %v822_v52 = vpop.permute.xlu0 %821  ;;  %v1366_v25 = vsel %vm1355_vm5, %v1238_v31, %v1365_v17  ;;  %v334_v31 = vmul.f32 -0.5, %v3264_v51 }
 0x1f8   :  { %v1395_v24 = vsel %vm1379_vm6, %v1366_v25, -inf  ;;  %v1246_v49 = vrot.slane %v822_v52, %v3040_v12  ;;  %v1251_v23 = vrot.slane %v825_v18, %v3043_v13  ;;  %v336_v18 = vmul.f32 -0.5, %v3268_v53 }
 0x1f9   :  { %1396 = vmax.xlane.f32.xlu0 %v1395_v24  ;;  %v3966_v17 = vadd.f32 %v3272_v10, %v334_v31  ;;  %v3975_v25 = vadd.f32 %v3284_v20, %v334_v31  ;;  %v3983_v51 = vadd.f32 %v3304_v29, %v334_v31  ;;  %v4881_v31 = vld [vmem:[#allocation9_spill] sm:$0xff] }
 0x1fa   :  { %v1247_v37 = vsel %vm900_vm1, %v1246_v49, %v1242_v14  ;;  %v3971_v52 = vadd.f32 %v3282_v60, %v336_v18  ;;  %v3979_v24 = vadd.f32 %v3292_v63, %v336_v18  ;;  %v3987_v53 = vadd.f32 %v3322_v5, %v336_v18 }
 0x1fb   :  { %v831_v3 = vpop.permute.xlu1 %830  ;;  %v828_v56 = vpop.permute.xlu0 %827  ;;  %v1252_v32 = vsel %vm907_vm2, %v1251_v23, %v1247_v37 }
 0x1fc   :  { %v1261_v6 = vrot.slane %v831_v3, %v3034_v7  ;;  %v1256_v54 = vrot.slane %v828_v56, %v3051_v16 }
 0x1fe   :  { %v1257_v30 = vsel %vm914_vm3, %v1256_v54, %v1252_v32 }
 0x1ff   :  { %v837_v41 = vpop.permute.xlu1 %836  ;;  %v834_v36 = vpop.permute.xlu0 %833 }
 0x200   :  { %v1265_v33 = vrot.slane %v834_v36, %v3040_v12  ;;  %v1270_v2 = vrot.slane %v837_v41, %v3043_v13 }
 0x202   :  { %v1266_v45 = vsel %vm900_vm1, %v1265_v33, %v1261_v6 }
 0x203   :  { %v843_v61 = vpop.permute.xlu1 %842  ;;  %v840_v48 = vpop.permute.xlu0 %839  ;;  %v1271_v9 = vsel %vm907_vm2, %v1270_v2, %v1266_v45 }
 0x204   :  { %v1275_v47 = vrot.slane %v840_v48, %v3051_v16  ;;  %v1280_v46 = vrot.slane %v843_v61, %v3034_v7 }
 0x206   :  { %v1276_v38 = vsel %vm914_vm3, %v1275_v47, %v1271_v9 }
 0x207   :  { %v849_v19 = vpop.permute.xlu1 %848  ;;  %v846_v55 = vpop.permute.xlu0 %845  ;;  %v1367_v42 = vsel %vm1353_vm4, %v1276_v38, %v1257_v30  ;;  %v4879_v30 = vld [vmem:[#allocation46_spill] sm:$0xff] }
 0x208   :  { %v1284_v40 = vrot.slane %v846_v55, %v3040_v12  ;;  %v1289_v34 = vrot.slane %v849_v19, %v3043_v13 }
 0x20a   :  { %v1285_v39 = vsel %vm900_vm1, %v1284_v40, %v1280_v46 }
 0x20b   :  { %v852_v26 = vpop.permute.xlu0 %851  ;;  %v1290_v44 = vsel %vm907_vm2, %v1289_v34, %v1285_v39  ;;  %v4878_v39 = vld [vmem:[#allocation44_spill] sm:$0xff] }
 0x20c   :  { %v1294_v59 = vrot.slane %v852_v26, %v3051_v16 }
 0x20e   :  { %v1295_v21 = vsel %vm914_vm3, %v1294_v59, %v1290_v44 }
 0x20f   :  { %v1368_v62 = vsel %vm1355_vm5, %v1295_v21, %v1367_v42  ;;  %v4018_v45 = vpop.permute.xlu0 %857  ;;  %v4880_v21 = vld [vmem:[#allocation7_spill] sm:$0xff] }
 0x210   :  { %v1398_v35 = vsel %vm1379_vm6, %v1368_v62, -inf }
 0x211   :  { %1399 = vmax.xlane.f32.xlu1 %v1398_v35 }
 0x222   :  { %854 = vperm.xlu1 %2794, %v3966_v17  }
 0x226   :  { %860 = vperm.xlu1 %2794, %v3971_v52  }
 0x22a   :  { %866 = vperm.xlu1 %2794, %v3975_v25  }
 0x22e   :  { %872 = vperm.xlu1 %2794, %v3979_v24  }
 0x232   :  { %878 = vperm.xlu1 %2794, %v3983_v51  }
 0x236   :  { %884 = vperm.xlu1 %2794, %v3987_v53  }
 0x239   :  { %v3990_v10 = vpop.xlane.xlu1 %1381 }
 0x23a   :  { %v3994_v60 = vrot.slane %v3990_v10, %v3048_v15  ;;  %v4002_v3 = vrot.slane %v3990_v10, %v3209_v4 }
 0x23c   :  { %v1532_v20 = vsub.f32 %v3278_v58, %v3994_v60  ;;  %v1534_v63 = vsub.f32 %v3287_v22, %v3994_v60  ;;  %v1535_v5 = vsub.f32 %v3295_v0, %v3994_v60  ;;  %v1536_v41 = vsub.f32 %v3298_v27, %v4002_v3 }
 0x23d   :  { %v4010_v58 = vrot.slane %v3990_v10, %v3213_v8  ;;  %v1538_v22 = vsub.f32 %v3310_v1, %v4002_v3 }
 0x23e   :  { %v1628_v29 = vmul.f32 1.442695, %v1532_v20  ;;  %v1632_v56 = vmul.f32 1.442695, %v1534_v63  ;;  %v1634_v36 = vmul.f32 1.442695, %v1535_v5 }
 0x23f   :  { %v1636_v33 = vmul.f32 1.442695, %v1536_v41  ;;  %v1540_v0 = vsub.f32 %v3320_v28, %v4010_v58  ;;  %v1640_v48 = vmul.f32 1.442695, %v1538_v22  ;;  %v1542_v27 = vsub.f32 %v3332_v11, %v4010_v58  ;;  %v4020_v28 = vpop.permute.xlu0 %863  ;;  %v4883_v22 = vld [vmem:[#allocation13_spill] sm:$0xff] }
 0x240   :  { %2796 = vpow2.f32 %v1628_v29  ;;  %v4882_v29 = vld [vmem:[#allocation11_spill] sm:$0xff] }
 0x241   :  { %2798 = vpow2.f32 %v1632_v56  ;;  %v1644_v6 = vmul.f32 1.442695, %v1540_v0  ;;  %v1648_v1 = vmul.f32 1.442695, %v1542_v27 }
 0x242   :  { %2800 = vpow2.f32 %v1634_v36 }
 0x243   :  { %2802 = vpow2.f32 %v1636_v33  ;;  %v4022_v23 = vpop.permute.xlu0 %869 }
 0x244   :  { %2804 = vpow2.f32 %v1640_v48  ;;  %v4884_v48 = vld [vmem:[#allocation15_spill] sm:$0xff] }
 0x245   :  { %2806 = vpow2.f32 %v1644_v6 }
 0x246   :  { %2808 = vpow2.f32 %v1648_v1  ;;  %v4885_v1 = vld [vmem:[#allocation17_spill] sm:$0xff] }
 0x247   :  { %v4024_v11 = vpop.permute.xlu0 %875 }
 0x24a   :  { %v2797_v61 = vpop.eup %2796 }
 0x24b   :  { %1917 = vperm.xlu1 %2794, %v2797_v61   ;;  %v2799_v49 = vpop.eup %2798  ;;  %v4028_v40 = vpop.permute.xlu0 %881 }
 0x24c   :  { %v2801_v2 = vpop.eup %2800 }
 0x24d   :  { %v2803_v14 = vpop.eup %2802 }
 0x24e   :  { %v2805_v47 = vpop.eup %2804 }
 0x24f   :  { %1923 = vperm.xlu1 %2794, %v2799_v49   ;;  %v2807_v19 = vpop.eup %2806  ;;  %v4036_v34 = vpop.permute.xlu0 %887 }
 0x250   :  { %v2809_v55 = vpop.eup %2808 }
 0x253   :  { %1926 = vperm.xlu1 %2794, %v2801_v2   ;;  %v4044_v32 = vpop.xlane.xlu0 %1384 }
 0x254   :  { %v4048_v59 = vrot.slane %v4044_v32, %v3048_v15  ;;  %v4056_v35 = vrot.slane %v4044_v32, %v3209_v4  ;;  %v4064_v36 = vrot.slane %v4044_v32, %v3213_v8 }
 0x256   :  { %v1544_v42 = vsub.f32 %v4880_v21, %v4048_v59  ;;  %v1546_v18 = vsub.f32 %v4881_v31, %v4048_v59  ;;  %v1548_v5 = vsub.f32 %v4882_v29, %v4056_v35  ;;  %v1550_v33 = vsub.f32 %v4883_v22, %v4056_v35  ;;  %v4888_v31 = vld [vmem:[#allocation23_spill] sm:$0xff] }
 0x257   :  { %1929 = vperm.xlu1 %2794, %v2803_v14   ;;  %v1552_v49 = vsub.f32 %v4884_v48, %v4064_v36  ;;  %v4070_v6 = vpop.xlane.xlu0 %1387  ;;  %v1554_v14 = vsub.f32 %v4885_v1, %v4064_v36 }
 0x258   :  { %v1652_v20 = vmul.f32 1.442695, %v1544_v42  ;;  %v1656_v56 = vmul.f32 1.442695, %v1546_v18  ;;  %v1660_v61 = vmul.f32 1.442695, %v1548_v5  ;;  %v4092_v5 = vrot.slane %v4070_v6, %v3213_v8 }
 0x259   :  { %v1664_v27 = vmul.f32 1.442695, %v1550_v33 }
 0x25b   :  { %1935 = vperm.xlu1 %2794, %v2805_v47   ;;  %v1668_v47 = vmul.f32 1.442695, %v1552_v49 }
 0x25f   :  { %1941 = vperm.xlu1 %2794, %v2807_v19   ;;  %v4076_v19 = vrot.slane %v4070_v6, %v3048_v15 }
 0x263   :  { %1947 = vperm.xlu1 %2794, %v2809_v55  }
 0x26e   :  { %v4026_v46 = vpop.xlane.xlu1 %1393 }
 0x26f   :  { %v4032_v37 = vrot.slane %v4026_v46, %v3048_v15  ;;  %v4040_v9 = vrot.slane %v4026_v46, %v3209_v4 }
 0x271   :  { %v1580_v54 = vsub.f32 %v3498_v57, %v4032_v37  ;;  %v1582_v38 = vsub.f32 %v4878_v39, %v4032_v37  ;;  %v1584_v44 = vsub.f32 %v4879_v30, %v4040_v9  ;;  %v4886_v39 = vld [vmem:[#allocation19_spill] sm:$0xff]  ;;  %v4082_v30 = vrot.slane %v4070_v6, %v3209_v4 }
 0x273   :  { %v1724_v26 = vmul.f32 1.442695, %v1580_v54  ;;  %v1728_v57 = vmul.f32 1.442695, %v1582_v38  ;;  %v1732_v62 = vmul.f32 1.442695, %v1584_v44  ;;  %v1556_v38 = vsub.f32 %v4886_v39, %v4076_v19 }
 0x274   :  { %v1672_v54 = vmul.f32 1.442695, %v1554_v14  ;;  %v4887_v44 = vld [vmem:[#allocation21_spill] sm:$0xff]  ;;  %v1560_v18 = vsub.f32 %v4888_v31, %v4082_v30  ;;  %v1322_v31 = vrot.slane %v4022_v23, %v3040_v12 }
 0x275   :  { %2810 = vpow2.f32 %v1724_v26  ;;  %v1676_v21 = vmul.f32 1.442695, %v1556_v38  ;;  %v4891_v14 = vld [vmem:[#allocation29_spill] sm:$0xff] }
 0x276   :  { %2812 = vpow2.f32 %v1728_v57  ;;  %v1558_v57 = vsub.f32 %v4887_v44, %v4076_v19  ;;  %v1684_v22 = vmul.f32 1.442695, %v1560_v18 }
 0x277   :  { %2814 = vpow2.f32 %v1732_v62 }
 0x278   :  { %2816 = vpow2.f32 %v1652_v20  ;;  %v1680_v20 = vmul.f32 1.442695, %v1558_v57  ;;  %v4892_v57 = vld [vmem:[#allocation31_spill] sm:$0xff] }
 0x279   :  { %2818 = vpow2.f32 %v1656_v56  ;;  %v4889_v56 = vld [vmem:[#allocation25_spill] sm:$0xff] }
 0x27a   :  { %2820 = vpow2.f32 %v1660_v61 }
 0x27b   :  { %2822 = vpow2.f32 %v1664_v27  ;;  %v4098_v27 = vpop.xlane.xlu0 %1390 }
 0x27c   :  { %2824 = vpow2.f32 %v1668_v47  ;;  %v1566_v47 = vsub.f32 %v4891_v14, %v4092_v5 }
 0x27d   :  { %2826 = vpow2.f32 %v1672_v54  ;;  %v4104_v54 = vrot.slane %v4098_v27, %v3048_v15 }
 0x27e   :  { %2828 = vpow2.f32 %v1676_v21  ;;  %v1696_v44 = vmul.f32 1.442695, %v1566_v47 }
 0x27f   :  { %v2811_v63 = vpop.eup %2810  ;;  %2830 = vpow2.f32 %v1680_v20  ;;  %v1568_v21 = vsub.f32 %v4892_v57, %v4104_v54 }
 0x280   :  { %2061 = vperm.xlu1 %2794, %v2811_v63   ;;  %v2813_v41 = vpop.eup %2812  ;;  %2832 = vpow2.f32 %v1684_v22  ;;  %v4118_v22 = vrot.slane %v4098_v27, %v3209_v4 }
 0x281   :  { %v2815_v0 = vpop.eup %2814  ;;  %v1700_v23 = vmul.f32 1.442695, %v1568_v21 }
 0x282   :  { %v2817_v2 = vpop.eup %2816 }
 0x283   :  { %v2819_v55 = vpop.eup %2818 }
 0x284   :  { %2067 = vperm.xlu1 %2794, %v2813_v41   ;;  %v2821_v26 = vpop.eup %2820  ;;  %v1562_v41 = vsub.f32 %v4889_v56, %v4082_v30 }
 0x285   :  { %v2823_v42 = vpop.eup %2822 }
 0x286   :  { %v2825_v63 = vpop.eup %2824  ;;  %v1688_v49 = vmul.f32 1.442695, %v1562_v41  ;;  %v1303_v41 = vrot.slane %v4018_v45, %v3040_v12 }
 0x287   :  { %v2827_v33 = vpop.eup %2826 }
 0x288   :  { %2073 = vperm.xlu1 %2794, %v2815_v0   ;;  %v4890_v0 = vld [vmem:[#allocation27_spill] sm:$0xff]  ;;  %2834 = vpow2.f32 %v1688_v49  ;;  %v1332_v49 = vrot.slane %v4024_v11, %v3051_v16 }
 0x289   :  { %v1564_v48 = vsub.f32 %v4890_v0, %v4092_v5 }
 0x28c   :  { %1953 = vperm.xlu1 %2794, %v2817_v2   ;;  %v2829_v2 = vpop.eup %2828 }
 0x28d   :  { %v2831_v39 = vpop.eup %2830 }
 0x28e   :  { %v2833_v20 = vpop.eup %2832 }
 0x290   :  { %1959 = vperm.xlu1 %2794, %v2819_v55   ;;  %v1692_v55 = vmul.f32 1.442695, %v1564_v48 }
 0x292   :  { %2836 = vpow2.f32 %v1692_v55  ;;  %v1313_v55 = vrot.slane %v4020_v28, %v3051_v16 }
 0x293   :  { %2838 = vpow2.f32 %v1696_v44 }
 0x294   :  { %1965 = vperm.xlu1 %2794, %v2821_v26   ;;  %2840 = vpow2.f32 %v1700_v23 }
 0x298   :  { %1971 = vperm.xlu1 %2794, %v2823_v42  }
 0x29c   :  { %1977 = vperm.xlu1 %2794, %v2825_v63  }
 0x29e   :  { %v4086_v62 = vpop.xlane.xlu1 %1399 }
 0x2a0   :  { %1983 = vperm.xlu1 %2794, %v2827_v33   ;;  %v4893_v33 = vld [vmem:[#allocation33_spill] sm:$0xff] }
 0x2a1   :  { %v1570_v0 = vsub.f32 %v4893_v33, %v4104_v54 }
 0x2a2   :  { %v855_v29 = vpop.permute.xlu1 %854 }
 0x2a3   :  { %v1299_v18 = vrot.slane %v855_v29, %v3034_v7  ;;  %v1704_v57 = vmul.f32 1.442695, %v1570_v0 }
 0x2a4   :  { %1989 = vperm.xlu1 %2794, %v2829_v2   ;;  %v2835_v2 = vpop.eup %2834 }
 0x2a5   :  { %v1304_v45 = vsel %vm900_vm1, %v1303_v41, %v1299_v18  ;;  %v2837_v28 = vpop.eup %2836  ;;  %v4146_v18 = vrot.slane %v4098_v27, %v3213_v8  ;;  %2842 = vpow2.f32 %v1704_v57  ;;  %v4164_v57 = vrot.slane %v4026_v46, %v3213_v8 }
 0x2a6   :  { %v861_v61 = vpop.permute.xlu1 %860  ;;  %v2839_v0 = vpop.eup %2838 }
 0x2a7   :  { %v1308_v63 = vrot.slane %v861_v61, %v3043_v13 }
 0x2a8   :  { %1995 = vperm.xlu1 %2794, %v2831_v39   ;;  %v1351_v39 = vrot.slane %v4036_v34, %v3051_v16 }
 0x2a9   :  { %v1309_v14 = vsel %vm907_vm2, %v1308_v63, %v1304_v45  ;;  %v4895_v63 = vld [vmem:[#allocation37_spill] sm:$0xff]  ;;  %v2841_v45 = vpop.eup %2840 }
 0x2aa   :  { %v867_v1 = vpop.permute.xlu1 %866 }
 0x2ab   :  { %v1318_v26 = vrot.slane %v867_v1, %v3034_v7  ;;  %v1341_v1 = vrot.slane %v4028_v40, %v3040_v12 }
 0x2ac   :  { %2001 = vperm.xlu1 %2794, %v2833_v20  }
 0x2ad   :  { %v1323_v48 = vsel %vm900_vm1, %v1322_v31, %v1318_v26  ;;  %v4894_v26 = vld [vmem:[#allocation35_spill] sm:$0xff] }
 0x2ae   :  { %v873_v38 = vpop.permute.xlu1 %872  ;;  %v1572_v44 = vsub.f32 %v4894_v26, %v4118_v22 }
 0x2af   :  { %v1327_v42 = vrot.slane %v873_v38, %v3043_v13 }
 0x2b0   :  { %2007 = vperm.xlu1 %2794, %v2835_v2   ;;  %v1708_v41 = vmul.f32 1.442695, %v1572_v44  ;;  %v4898_v2 = vld [vmem:[#allocation3_spill] sm:$0xff] }
 0x2b1   :  { %v1328_v29 = vsel %vm907_vm2, %v1327_v42, %v1323_v48  ;;  %v1314_v42 = vsel %vm914_vm3, %v1313_v55, %v1309_v14  ;;  %v4896_v48 = vld [vmem:[#allocation2_spill] sm:$0xff] }
 0x2b2   :  { %v879_v56 = vpop.permute.xlu1 %878  ;;  %v1333_v11 = vsel %vm914_vm3, %v1332_v49, %v1328_v29  ;;  %v1533_v23 = vsub.f32 %v4896_v48, %v3994_v60  ;;  %v4897_v29 = vld [vmem:[#allocation39_spill] sm:$0xff]  ;;  %2844 = vpow2.f32 %v1708_v41  ;;  %v4900_v60 = vld [vmem:[#allocation4_spill] sm:$0xff] }
 0x2b3   :  { %v1337_v61 = vrot.slane %v879_v56, %v3034_v7  ;;  %v1369_v34 = vsel %vm1353_vm4, %v1333_v11, %v1314_v42  ;;  %v1574_v56 = vsub.f32 %v4895_v63, %v4118_v22  ;;  %v1539_v11 = vsub.f32 %v4900_v60, %v4002_v3 }
 0x2b4   :  { %2013 = vperm.xlu1 %2794, %v2837_v28   ;;  %v1630_v14 = vmul.f32 1.442695, %v1533_v23  ;;  %v4902_v28 = vld [vmem:[#allocation5_spill] sm:$0xff]  ;;  %v4905_v23 = vld [vmem:[#allocation52_spill] sm:$0xff] }
 0x2b5   :  { %v1342_v40 = vsel %vm900_vm1, %v1341_v1, %v1337_v61  ;;  %v1576_v61 = vsub.f32 %v4897_v29, %v4146_v18  ;;  %v1712_v49 = vmul.f32 1.442695, %v1574_v56  ;;  %v1537_v1 = vsub.f32 %v4898_v2, %v4002_v3  ;;  %v4903_v3 = vld [vmem:[#allocation50_spill] sm:$0xff]  ;;  %v4172_v56 = vpop.xlane.xlu0 %1396 }
 0x2b6   :  { %v885_v47 = vpop.permute.xlu1 %884  ;;  %v1590_v29 = vsub.f32 %v4905_v23, %v4164_v57 }
 0x2b7   :  { %v1346_v38 = vrot.slane %v885_v47, %v3043_v13  ;;  %v4899_v47 = vld [vmem:[#allocation41_spill] sm:$0xff]  ;;  %2846 = vpow2.f32 %v1712_v49  ;;  %v1638_v26 = vmul.f32 1.442695, %v1537_v1  ;;  %v4180_v49 = vrot.slane %v4172_v56, %v3048_v15 }
 0x2b8   :  { %2019 = vperm.xlu1 %2794, %v2839_v0   ;;  %v1578_v55 = vsub.f32 %v4899_v47, %v4146_v18  ;;  %2848 = vpow2.f32 %v1630_v14  ;;  %v4906_v14 = vld [vmem:[#allocation43_spill] sm:$0xff] }
 0x2b9   :  { %v1347_v21 = vsel %vm907_vm2, %v1346_v38, %v1342_v40  ;;  %v2843_v38 = vpop.eup %2842  ;;  %v4901_v40 = vld [vmem:[#allocation48_spill] sm:$0xff]  ;;  %v1581_v47 = vsub.f32 %v4906_v14, %v4032_v37 }
 0x2ba   :  { %v1352_v31 = vsel %vm914_vm3, %v1351_v39, %v1347_v21  ;;  %v1716_v39 = vmul.f32 1.442695, %v1576_v61  ;;  %v1720_v44 = vmul.f32 1.442695, %v1578_v55  ;;  %v1586_v21 = vsub.f32 %v4901_v40, %v4040_v9  ;;  %v4907_v55 = vld [vmem:[#allocation54_spill] sm:$0xff] }
 0x2bb   :  { %v1370_v20 = vsel %vm1355_vm5, %v1352_v31, %v1369_v34  ;;  %v1541_v31 = vsub.f32 %v4902_v28, %v4010_v58  ;;  %v1642_v34 = vmul.f32 1.442695, %v1539_v11  ;;  %v4908_v11 = vld [vmem:[#allocation45_spill] sm:$0xff]  ;;  %v4190_v40 = vrot.slane %v4172_v56, %v3209_v4 }
 0x2bc   :  { %v1401_v33 = vsel %vm1379_vm6, %v1370_v20, -inf  ;;  %2025 = vperm.xlu1 %2794, %v2841_v45   ;;  %2850 = vpow2.f32 %v1716_v39  ;;  %v2845_v42 = vpop.eup %2844  ;;  %v1588_v20 = vsub.f32 %v4903_v3, %v4164_v57  ;;  %v1736_v63 = vmul.f32 1.442695, %v1586_v21  ;;  %v4909_v21 = vld [vmem:[#allocation56_spill] sm:$0xff]  ;;  %v4910_v3 = vld [vmem:[#allocation47_spill] sm:$0xff] }
 0x2bd   :  { %1402 = vmax.xlane.f32.xlu0 %v1401_v33  ;;  %2852 = vpow2.f32 %v1638_v26  ;;  %v4904_v33 = vld [vmem:[#allocation6_spill] sm:$0xff]  ;;  %v1646_v48 = vmul.f32 1.442695, %v1541_v31  ;;  %v1592_v39 = vsub.f32 %v4907_v55, %v4180_v49  ;;  %v1583_v26 = vsub.f32 %v4908_v11, %v4032_v37 }
 0x2be   :  { %2854 = vpow2.f32 %v1720_v44  ;;  %v1543_v0 = vsub.f32 %v4904_v33, %v4010_v58  ;;  %v1740_v61 = vmul.f32 1.442695, %v1588_v20  ;;  %v1744_v58 = vmul.f32 1.442695, %v1590_v29  ;;  %v4912_v29 = vld [vmem:[#allocation8_spill] sm:$0xff] }
 0x2bf   :  { %2856 = vpow2.f32 %v1642_v34  ;;  %v1726_v44 = vmul.f32 1.442695, %v1581_v47  ;;  %v1748_v28 = vmul.f32 1.442695, %v1592_v39  ;;  %v1585_v20 = vsub.f32 %v4910_v3, %v4040_v9  ;;  %v4914_v39 = vld [vmem:[#allocation10_spill] sm:$0xff] }
 0x2c0   :  { %2031 = vperm.xlu1 %2794, %v2843_v38   ;;  %2858 = vpow2.f32 %v1736_v63  ;;  %v1650_v1 = vmul.f32 1.442695, %v1543_v0  ;;  %v1730_v63 = vmul.f32 1.442695, %v1583_v26  ;;  %v4198_v37 = vrot.slane %v4172_v56, %v3213_v8  ;;  %v4917_v3 = vld [vmem:[#allocation70_spill] sm:$0xff] }
 0x2c1   :  { %v2847_v41 = vpop.eup %2846  ;;  %2860 = vpow2.f32 %v1646_v48  ;;  %v4208_v47 = vrot.slane %v4086_v62, %v3048_v15  ;;  %v4214_v26 = vrot.slane %v4086_v62, %v3209_v4 }
 0x2c2   :  { %v2849_v45 = vpop.eup %2848  ;;  %2862 = vpow2.f32 %v1740_v61  ;;  %v1545_v61 = vsub.f32 %v4912_v29, %v4048_v59 }
 0x2c3   :  { %2864 = vpow2.f32 %v1650_v1 }
 0x2c4   :  { %2037 = vperm.xlu1 %2794, %v2845_v42   ;;  %2866 = vpow2.f32 %v1744_v58  ;;  %v1594_v42 = vsub.f32 %v4909_v21, %v4180_v49 }
 0x2c5   :  { %2868 = vpow2.f32 %v1726_v44  ;;  %v4915_v44 = vld [vmem:[#allocation66_spill] sm:$0xff] }
 0x2c6   :  { %v2851_v2 = vpop.eup %2850  ;;  %2870 = vpow2.f32 %v1748_v28  ;;  %v1752_v0 = vmul.f32 1.442695, %v1594_v42  ;;  %v1604_v21 = vsub.f32 %v4915_v44, %v4208_v47 }
 0x2c7   :  { %v2853_v38 = vpop.eup %2852  ;;  %2872 = vpow2.f32 %v1730_v63 }
 0x2c8   :  { %2043 = vperm.xlu1 %2794, %v2847_v41   ;;  %v2855_v60 = vpop.eup %2854  ;;  %v4911_v41 = vld [vmem:[#allocation59_spill] sm:$0xff]  ;;  %2874 = vpow2.f32 %v1752_v0  ;;  %v1772_v63 = vmul.f32 1.442695, %v1604_v21  ;;  %v4918_v0 = vld [vmem:[#allocation14_spill] sm:$0xff] }
 0x2c9   :  { %v2857_v31 = vpop.eup %2856  ;;  %v1597_v33 = vsub.f32 %v4911_v41, %v4190_v40 }
 0x2ca   :  { %v2859_v34 = vpop.eup %2858  ;;  %v4224_v29 = vpop.permute.xlu1 %1917 }
 0x2cb   :  { %v2861_v48 = vpop.eup %2860  ;;  %v1758_v14 = vmul.f32 1.442695, %v1597_v33 }
 0x2cc   :  { %2049 = vperm.xlu1 %2794, %v2851_v2   ;;  %v2863_v23 = vpop.eup %2862  ;;  %v4913_v2 = vld [vmem:[#allocation62_spill] sm:$0xff] }
 0x2cd   :  { %v1600_v1 = vsub.f32 %v4913_v2, %v4198_v37  ;;  %v2865_v58 = vpop.eup %2864 }
 0x2ce   :  { %v2867_v55 = vpop.eup %2866  ;;  %v4232_v44 = vpop.permute.xlu1 %1923 }
 0x2cf   :  { %v1764_v11 = vmul.f32 1.442695, %v1600_v1  ;;  %v2869_v42 = vpop.eup %2868 }
 0x2d0   :  { %2055 = vperm.xlu1 %2794, %v2855_v60   ;;  %v1654_v60 = vmul.f32 1.442695, %v1545_v61  ;;  %v2871_v28 = vpop.eup %2870  ;;  %v4919_v61 = vld [vmem:[#allocation57_spill] sm:$0xff] }
 0x2d1   :  { %v2873_v41 = vpop.eup %2872 }
 0x2d2   :  { %v2875_v33 = vpop.eup %2874 }
 0x2d3   :  { %1920 = vperm.xlu0 %2793, %v2849_v45   ;;  %v1734_v45 = vmul.f32 1.442695, %v1585_v20  ;;  %v1608_v20 = vsub.f32 %v4917_v3, %v4214_v26  ;;  %v4923_v3 = vld [vmem:[#allocation72_spill] sm:$0xff] }
 0x2d4   :  { %2079 = vperm.xlu1 %2794, %v2859_v34  }
 0x2d5   :  { %2876 = vpow2.f32 %v1734_v45  ;;  %v1595_v45 = vsub.f32 %v4919_v61, %v4180_v49  ;;  %v1780_v2 = vmul.f32 1.442695, %v1608_v20  ;;  %v1610_v20 = vsub.f32 %v4923_v3, %v4214_v26 }
 0x2d6   :  { %2878 = vpow2.f32 %v1758_v14 }
 0x2d7   :  { %1932 = vperm.xlu0 %2793, %v2853_v38   ;;  %v1547_v38 = vsub.f32 %v4914_v39, %v4048_v59  ;;  %2880 = vpow2.f32 %v1654_v60  ;;  %v1754_v60 = vmul.f32 1.442695, %v1595_v45  ;;  %v1784_v45 = vmul.f32 1.442695, %v1610_v20 }
 0x2d8   :  { %2085 = vperm.xlu1 %2794, %v2863_v23   ;;  %2882 = vpow2.f32 %v1764_v11 }
 0x2d9   :  { %v1658_v59 = vmul.f32 1.442695, %v1547_v38 }
 0x2db   :  { %1938 = vperm.xlu0 %2793, %v2857_v31   ;;  %v4916_v31 = vld [vmem:[#allocation12_spill] sm:$0xff]  ;;  %2884 = vpow2.f32 %v1658_v59  ;;  %v4238_v59 = vrot.slane %v4086_v62, %v3213_v8 }
 0x2dc   :  { %2091 = vperm.xlu1 %2794, %v2867_v55   ;;  %v1549_v34 = vsub.f32 %v4916_v31, %v4056_v35  ;;  %2886 = vpow2.f32 %v1772_v63 }
 0x2de   :  { %v1662_v23 = vmul.f32 1.442695, %v1549_v34 }
 0x2df   :  { %1944 = vperm.xlu0 %2793, %v2861_v48   ;;  %v1551_v48 = vsub.f32 %v4918_v0, %v4056_v35  ;;  %v2877_v1 = vpop.eup %2876  ;;  %v4921_v35 = vld [vmem:[#allocation64_spill] sm:$0xff] }
 0x2e0   :  { %2097 = vperm.xlu1 %2794, %v2871_v28   ;;  %v2879_v14 = vpop.eup %2878  ;;  %2888 = vpow2.f32 %v1662_v23  ;;  %v1602_v38 = vsub.f32 %v4921_v35, %v4198_v37  ;;  %v4924_v0 = vld [vmem:[#allocation20_spill] sm:$0xff]  ;;  %v4925_v23 = vld [vmem:[#allocation75_spill] sm:$0xff] }
 0x2e1   :  { %v1666_v39 = vmul.f32 1.442695, %v1551_v48  ;;  %2890 = vpow2.f32 %v1780_v2  ;;  %v2881_v11 = vpop.eup %2880  ;;  %v4244_v48 = vpop.permute.xlu1 %1926  ;;  %v1613_v61 = vsub.f32 %v4925_v23, %v4238_v59 }
 0x2e2   :  { %v2883_v21 = vpop.eup %2882  ;;  %v1768_v34 = vmul.f32 1.442695, %v1602_v38 }
 0x2e3   :  { %1950 = vperm.xlu0 %2793, %v2865_v58   ;;  %v4920_v58 = vld [vmem:[#allocation16_spill] sm:$0xff]  ;;  %2892 = vpow2.f32 %v1666_v39  ;;  %v1790_v39 = vmul.f32 1.442695, %v1613_v61 }
 0x2e4   :  { %2103 = vperm.xlu1 %2794, %v2875_v33   ;;  %v1553_v55 = vsub.f32 %v4920_v58, %v4064_v36  ;;  %2894 = vpow2.f32 %v1754_v60  ;;  %v4926_v58 = vld [vmem:[#allocation22_spill] sm:$0xff] }
 0x2e5   :  { %v2885_v63 = vpop.eup %2884  ;;  %v4250_v38 = vpop.permute.xlu1 %1929 }
 0x2e6   :  { %v1670_v31 = vmul.f32 1.442695, %v1553_v55  ;;  %v1559_v55 = vsub.f32 %v4926_v58, %v4076_v19 }
 0x2e7   :  { %2064 = vperm.xlu0 %2793, %v2869_v42   ;;  %v4922_v42 = vld [vmem:[#allocation18_spill] sm:$0xff] }
 0x2e8   :  { %2112 = vperm.xlu1 %2794, %v2879_v14   ;;  %v1555_v28 = vsub.f32 %v4922_v42, %v4064_v36  ;;  %2896 = vpow2.f32 %v1670_v31  ;;  %v1557_v36 = vsub.f32 %v4924_v0, %v4076_v19  ;;  %v1682_v42 = vmul.f32 1.442695, %v1559_v55  ;;  %v4928_v19 = vld [vmem:[#allocation26_spill] sm:$0xff] }
 0x2e9   :  { %2898 = vpow2.f32 %v1768_v34  ;;  %v4254_v34 = vpop.permute.xlu1 %1935  ;;  %v1563_v3 = vsub.f32 %v4928_v19, %v4082_v30 }
 0x2ea   :  { %v1674_v33 = vmul.f32 1.442695, %v1555_v28  ;;  %v1678_v14 = vmul.f32 1.442695, %v1557_v36 }
 0x2eb   :  { %2070 = vperm.xlu0 %2793, %v2873_v41   ;;  %v2887_v41 = vpop.eup %2886  ;;  %v1690_v36 = vmul.f32 1.442695, %v1563_v3 }
 0x2ec   :  { %2121 = vperm.xlu1 %2794, %v2883_v21   ;;  %v2889_v2 = vpop.eup %2888  ;;  %2900 = vpow2.f32 %v1674_v33  ;;  %v4929_v33 = vld [vmem:[#allocation28_spill] sm:$0xff] }
 0x2ed   :  { %2902 = vpow2.f32 %v1784_v45  ;;  %v1565_v0 = vsub.f32 %v4929_v33, %v4092_v5  ;;  %v4260_v61 = vpop.permute.xlu1 %1941 }
 0x2ee   :  { %2904 = vpow2.f32 %v1678_v14 }
 0x2ef   :  { %2076 = vperm.xlu0 %2793, %v2877_v1   ;;  %v2891_v1 = vpop.eup %2890  ;;  %2906 = vpow2.f32 %v1790_v39  ;;  %v4931_v39 = vld [vmem:[#allocation32_spill] sm:$0xff] }
 0x2f0   :  { %2133 = vperm.xlu1 %2794, %v2887_v41   ;;  %v2893_v35 = vpop.eup %2892  ;;  %2908 = vpow2.f32 %v1682_v42 }
 0x2f1   :  { %v2895_v60 = vpop.eup %2894  ;;  %v4264_v58 = vpop.permute.xlu1 %1947 }
 0x2f2   :  { %v2897_v28 = vpop.eup %2896 }
 0x2f3   :  { %1956 = vperm.xlu0 %2793, %v2881_v11   ;;  %v4927_v11 = vld [vmem:[#allocation24_spill] sm:$0xff]  ;;  %v2899_v31 = vpop.eup %2898 }
 0x2f4   :  { %2145 = vperm.xlu1 %2794, %v2891_v1   ;;  %v1561_v21 = vsub.f32 %v4927_v11, %v4082_v30  ;;  %v1694_v1 = vmul.f32 1.442695, %v1565_v0 }
 0x2f6   :  { %v1686_v20 = vmul.f32 1.442695, %v1561_v21  ;;  %v4932_v21 = vld [vmem:[#allocation34_spill] sm:$0xff] }
 0x2f7   :  { %1962 = vperm.xlu0 %2793, %v2885_v63   ;;  %v2901_v63 = vpop.eup %2900  ;;  %v1571_v42 = vsub.f32 %v4932_v21, %v4104_v54 }
 0x2f8   :  { %2106 = vperm.xlu1 %2794, %v2895_v60   ;;  %v2903_v41 = vpop.eup %2902  ;;  %2910 = vpow2.f32 %v1686_v20 }
 0x2f9   :  { %v2905_v23 = vpop.eup %2904  ;;  %2912 = vpow2.f32 %v1690_v36  ;;  %v1706_v3 = vmul.f32 1.442695, %v1571_v42 }
 0x2fa   :  { %v2907_v45 = vpop.eup %2906  ;;  %2914 = vpow2.f32 %v1694_v1  ;;  %v4936_v1 = vld [vmem:[#allocation42_spill] sm:$0xff] }
 0x2fb   :  { %1968 = vperm.xlu0 %2793, %v2889_v2   ;;  %v4930_v2 = vld [vmem:[#allocation30_spill] sm:$0xff]  ;;  %v2909_v14 = vpop.eup %2908 }
 0x2fc   :  { %2127 = vperm.xlu1 %2794, %v2899_v31   ;;  %v1567_v30 = vsub.f32 %v4930_v2, %v4092_v5  ;;  %v4933_v31 = vld [vmem:[#allocation36_spill] sm:$0xff] }
 0x2fd   :  { %v1573_v19 = vsub.f32 %v4933_v31, %v4118_v22 }
 0x2fe   :  { %v1698_v55 = vmul.f32 1.442695, %v1567_v30 }
 0x2ff   :  { %1974 = vperm.xlu0 %2793, %v2893_v35   ;;  %v1569_v35 = vsub.f32 %v4931_v39, %v4104_v54  ;;  %v4268_v11 = vpop.permute.xlu1 %2061  ;;  %v1710_v0 = vmul.f32 1.442695, %v1573_v19  ;;  %v4935_v54 = vld [vmem:[#allocation40_spill] sm:$0xff] }
 0x300   :  { %2151 = vperm.xlu1 %2794, %v2903_v41   ;;  %2916 = vpow2.f32 %v1698_v55  ;;  %v4934_v41 = vld [vmem:[#allocation38_spill] sm:$0xff] }
 0x301   :  { %v1702_v5 = vmul.f32 1.442695, %v1569_v35  ;;  %v1575_v33 = vsub.f32 %v4934_v41, %v4118_v22 }
 0x302   :  { %v2911_v60 = vpop.eup %2910 }
 0x303   :  { %1980 = vperm.xlu0 %2793, %v2897_v28   ;;  %v2913_v28 = vpop.eup %2912  ;;  %2918 = vpow2.f32 %v1702_v5  ;;  %v4274_v20 = vpop.permute.xlu1 %2067  ;;  %v1714_v2 = vmul.f32 1.442695, %v1575_v33 }
 0x304   :  { %2160 = vperm.xlu1 %2794, %v2907_v45   ;;  %2920 = vpow2.f32 %v1706_v3  ;;  %v1577_v45 = vsub.f32 %v4935_v54, %v4146_v18  ;;  %v4939_v3 = vld [vmem:[#allocation53_spill] sm:$0xff] }
 0x305   :  { %2922 = vpow2.f32 %v1710_v0 }
 0x306   :  { %2924 = vpow2.f32 %v1714_v2  ;;  %v1718_v55 = vmul.f32 1.442695, %v1577_v45 }
 0x307   :  { %1986 = vperm.xlu0 %2793, %v2901_v63   ;;  %v2915_v63 = vpop.eup %2914 }
 0x308   :  { %2926 = vpow2.f32 %v1718_v55  ;;  %v4942_v55 = vld [vmem:[#allocation60_spill] sm:$0xff] }
 0x30a   :  { %v2917_v36 = vpop.eup %2916 }
 0x30b   :  { %1992 = vperm.xlu0 %2793, %v2905_v23   ;;  %v4278_v23 = vpop.permute.xlu1 %2073 }
 0x30d   :  { %v2919_v30 = vpop.eup %2918 }
 0x30e   :  { %v2921_v22 = vpop.eup %2920 }
 0x30f   :  { %1998 = vperm.xlu0 %2793, %v2909_v14   ;;  %v1579_v14 = vsub.f32 %v4936_v1, %v4146_v18  ;;  %v4284_v39 = vpop.permute.xlu1 %1953  ;;  %v2923_v42 = vpop.eup %2922 }
 0x310   :  { %v2925_v19 = vpop.eup %2924 }
 0x311   :  { %v1722_v35 = vmul.f32 1.442695, %v1579_v14 }
 0x312   :  { %v2927_v0 = vpop.eup %2926 }
 0x313   :  { %2004 = vperm.xlu0 %2793, %v2911_v60   ;;  %v4937_v60 = vld [vmem:[#allocation49_spill] sm:$0xff]  ;;  %v4288_v5 = vpop.permute.xlu1 %1959  ;;  %2928 = vpow2.f32 %v1722_v35 }
 0x314   :  { %v1587_v21 = vsub.f32 %v4937_v60, %v4040_v9 }
 0x316   :  { %v1738_v18 = vmul.f32 1.442695, %v1587_v21 }
 0x317   :  { %2010 = vperm.xlu0 %2793, %v2913_v28   ;;  %v4938_v28 = vld [vmem:[#allocation51_spill] sm:$0xff]  ;;  %v4294_v33 = vpop.permute.xlu1 %1965 }
 0x318   :  { %v1589_v31 = vsub.f32 %v4938_v28, %v4164_v57  ;;  %2930 = vpow2.f32 %v1738_v18 }
 0x31a   :  { %v1742_v41 = vmul.f32 1.442695, %v1589_v31 }
 0x31b   :  { %2016 = vperm.xlu0 %2793, %v2915_v63   ;;  %v1591_v63 = vsub.f32 %v4939_v3, %v4164_v57  ;;  %v4298_v2 = vpop.permute.xlu1 %1971  ;;  %v4944_v3 = vld [vmem:[#allocation67_spill] sm:$0xff] }
 0x31c   :  { %2932 = vpow2.f32 %v1742_v41 }
 0x31d   :  { %v1746_v9 = vmul.f32 1.442695, %v1591_v63  ;;  %v2929_v45 = vpop.eup %2928  ;;  %v1605_v63 = vsub.f32 %v4944_v3, %v4208_v47 }
 0x31f   :  { %2022 = vperm.xlu0 %2793, %v2917_v36   ;;  %v4940_v36 = vld [vmem:[#allocation55_spill] sm:$0xff]  ;;  %2934 = vpow2.f32 %v1746_v9  ;;  %v4304_v60 = vpop.permute.xlu1 %1977 }
 0x320   :  { %v1593_v54 = vsub.f32 %v4940_v36, %v4180_v49  ;;  %v4943_v49 = vld [vmem:[#allocation63_spill] sm:$0xff]  ;;  %v1774_v36 = vmul.f32 1.442695, %v1605_v63 }
 0x322   :  { %v1750_v57 = vmul.f32 1.442695, %v1593_v54  ;;  %v2931_v14 = vpop.eup %2930 }
 0x323   :  { %2028 = vperm.xlu0 %2793, %v2919_v30   ;;  %v4941_v30 = vld [vmem:[#allocation58_spill] sm:$0xff]  ;;  %v4308_v18 = vpop.permute.xlu1 %1983 }
 0x324   :  { %v1596_v1 = vsub.f32 %v4941_v30, %v4190_v40  ;;  %2936 = vpow2.f32 %v1750_v57 }
 0x326   :  { %v1756_v35 = vmul.f32 1.442695, %v1596_v1  ;;  %v2933_v21 = vpop.eup %2932 }
 0x327   :  { %2034 = vperm.xlu0 %2793, %v2921_v22   ;;  %v1598_v22 = vsub.f32 %v4942_v55, %v4190_v40  ;;  %v4314_v54 = vpop.permute.xlu1 %1989 }
 0x328   :  { %2938 = vpow2.f32 %v1756_v35  ;;  %v4947_v35 = vld [vmem:[#allocation78_spill] sm:$0xff] }
 0x329   :  { %v1760_v28 = vmul.f32 1.442695, %v1598_v22  ;;  %v2935_v31 = vpop.eup %2934 }
 0x32b   :  { %2040 = vperm.xlu0 %2793, %v2923_v42   ;;  %v1601_v42 = vsub.f32 %v4943_v49, %v4198_v37  ;;  %2940 = vpow2.f32 %v1760_v28  ;;  %v4948_v28 = vld [vmem:[#allocation80_spill] sm:$0xff] }
 0x32e   :  { %v2937_v41 = vpop.eup %2936 }
 0x32f   :  { %2046 = vperm.xlu0 %2793, %v2925_v19   ;;  %v1766_v19 = vmul.f32 1.442695, %v1601_v42  ;;  %v4330_v42 = vpop.permute.xlu1 %1995 }
 0x331   :  { %2942 = vpow2.f32 %v1766_v19 }
 0x332   :  { %2944 = vpow2.f32 %v1774_v36  ;;  %v4951_v36 = vld [vmem:[#allocation74_spill] sm:$0xff] }
 0x333   :  { %2052 = vperm.xlu0 %2793, %v2927_v0   ;;  %v4945_v0 = vld [vmem:[#allocation71_spill] sm:$0xff] }
 0x334   :  { %v1609_v9 = vsub.f32 %v4945_v0, %v4214_v26 }
 0x336   :  { %v1782_v22 = vmul.f32 1.442695, %v1609_v9 }
 0x337   :  { %2058 = vperm.xlu0 %2793, %v2929_v45   ;;  %v2939_v45 = vpop.eup %2938 }
 0x338   :  { %v2941_v49 = vpop.eup %2940  ;;  %2946 = vpow2.f32 %v1782_v22  ;;  %v4952_v22 = vld [vmem:[#allocation76_spill] sm:$0xff] }
 0x33b   :  { %2082 = vperm.xlu0 %2793, %v2931_v14   ;;  %v4946_v14 = vld [vmem:[#allocation61_spill] sm:$0xff]  ;;  %v2943_v63 = vpop.eup %2942 }
 0x33c   :  { %v1599_v55 = vsub.f32 %v4946_v14, %v4190_v40 }
 0x33f   :  { %2088 = vperm.xlu0 %2793, %v2933_v21  }
 0x343   :  { %2094 = vperm.xlu0 %2793, %v2935_v31   ;;  %v1762_v31 = vmul.f32 1.442695, %v1599_v55  ;;  %v4342_v55 = vpop.permute.xlu1 %2001 }
 0x347   :  { %2100 = vperm.xlu0 %2793, %v2937_v41   ;;  %v4950_v41 = vld [vmem:[#allocation69_spill] sm:$0xff] }
 0x348   :  { %v1607_v0 = vsub.f32 %v4950_v41, %v4208_v47 }
 0x34a   :  { %v4316_v30 = vpop.xlane.xlu0 %1402 }
 0x34b   :  { %v4320_v1 = vrot.slane %v4316_v30, %v3048_v15  ;;  %v4324_v57 = vrot.slane %v4316_v30, %v3209_v4  ;;  %2109 = vperm.xlu0 %2793, %v2939_v45   ;;  %v4949_v4 = vld [vmem:[#allocation68_spill] sm:$0xff]  ;;  %v1612_v45 = vsub.f32 %v4951_v36, %v4238_v59 }
 0x34c   :  { %v1606_v19 = vsub.f32 %v4949_v4, %v4208_v47 }
 0x34d   :  { %v1617_v21 = vsub.f32 %v4947_v35, %v4320_v1  ;;  %v1621_v15 = vsub.f32 %v4948_v28, %v4324_v57  ;;  %v2945_v35 = vpop.eup %2944  ;;  %v1778_v28 = vmul.f32 1.442695, %v1607_v0  ;;  %v1788_v47 = vmul.f32 1.442695, %v1612_v45 }
 0x34e   :  { %v1776_v14 = vmul.f32 1.442695, %v1606_v19  ;;  %v1622_v41 = vsub.f32 %v3979_v24, %v4324_v57  ;;  %v1620_v0 = vsub.f32 %v3975_v25, %v4324_v57 }
 0x34f   :  { %2115 = vperm.xlu0 %2793, %v2941_v49   ;;  %v1798_v3 = vmul.f32 1.442695, %v1617_v21  ;;  %v1806_v9 = vmul.f32 1.442695, %v1621_v15  ;;  %v1614_v21 = vsub.f32 %v4952_v22, %v4238_v59  ;;  %v1616_v15 = vsub.f32 %v3966_v17, %v4320_v1 }
 0x350   :  { %v1804_v22 = vmul.f32 1.442695, %v1620_v0 }
 0x351   :  { %2948 = vpow2.f32 %v1798_v3  ;;  %v1792_v19 = vmul.f32 1.442695, %v1614_v21  ;;  %v4352_v3 = vpop.permute.xlu1 %2007  ;;  %v1796_v17 = vmul.f32 1.442695, %v1616_v15  ;;  %v4954_v15 = vld [vmem:[#allocation79_spill] sm:$0xff] }
 0x352   :  { %v4336_v40 = vpop.permute.xlu0 %1920  ;;  %2950 = vpow2.f32 %v1762_v31  ;;  %v2947_v31 = vpop.eup %2946 }
 0x353   :  { %2124 = vperm.xlu0 %2793, %v2943_v63   ;;  %2952 = vpow2.f32 %v1806_v9  ;;  %v4356_v63 = vrot.slane %v4316_v30, %v3213_v8  ;;  %v1808_v8 = vmul.f32 1.442695, %v1622_v41  ;;  %v4955_v41 = vld [vmem:[#allocation73_spill] sm:$0xff] }
 0x354   :  { %2954 = vpow2.f32 %v1776_v14 }
 0x355   :  { %2956 = vpow2.f32 %v1778_v28  ;;  %v1625_v14 = vsub.f32 %v3736_v50, %v4356_v63  ;;  %v4368_v28 = vpop.permute.xlu1 %2013 }
 0x356   :  { %v4344_v49 = vpop.permute.xlu0 %1932  ;;  %2958 = vpow2.f32 %v1788_v47 }
 0x357   :  { %2136 = vperm.xlu0 %2793, %v2945_v35   ;;  %2960 = vpow2.f32 %v1792_v19  ;;  %v4953_v35 = vld [vmem:[#allocation65_spill] sm:$0xff]  ;;  %v1814_v19 = vmul.f32 1.442695, %v1625_v14 }
 0x358   :  { %v1603_v24 = vsub.f32 %v4953_v35, %v4198_v37  ;;  %2962 = vpow2.f32 %v1796_v17  ;;  %v2435_v17 = vrot.slane %v4268_v11, %v3034_v7  ;;  %v1618_v11 = vsub.f32 %v3971_v52, %v4320_v1 }
 0x359   :  { %2964 = vpow2.f32 %v1808_v8  ;;  %v4378_v35 = vpop.permute.xlu1 %2019 }
 0x35a   :  { %v4350_v4 = vpop.permute.xlu0 %1938  ;;  %v1770_v50 = vmul.f32 1.442695, %v1603_v24  ;;  %2966 = vpow2.f32 %v1804_v22  ;;  %v2444_v24 = vrot.slane %v4274_v20, %v3043_v13  ;;  %v1624_v20 = vsub.f32 %v3983_v51, %v4356_v63 }
 0x35b   :  { %2148 = vperm.xlu0 %2793, %v2947_v31   ;;  %v2949_v9 = vpop.eup %2948  ;;  %v1619_v31 = vsub.f32 %v4954_v15, %v4320_v1  ;;  %2968 = vpow2.f32 %v1814_v19 }
 0x35c   :  { %v2951_v36 = vpop.eup %2950  ;;  %2172 = vperm.xlu1 %2794, %v2949_v9   ;;  %v1611_v9 = vsub.f32 %v4955_v41, %v4214_v26  ;;  %2970 = vpow2.f32 %v1770_v50  ;;  %v1800_v50 = vmul.f32 1.442695, %v1618_v11 }
 0x35d   :  { %v2953_v21 = vpop.eup %2952  ;;  %v1802_v8 = vmul.f32 1.442695, %v1619_v31  ;;  %v4392_v52 = vpop.permute.xlu1 %2025 }
 0x35e   :  { %v4362_v45 = vpop.permute.xlu0 %1944  ;;  %v2955_v25 = vpop.eup %2954  ;;  %v1786_v26 = vmul.f32 1.442695, %v1611_v9 }
 0x35f   :  { %2118 = vperm.xlu0 %2793, %v2951_v36   ;;  %v2957_v37 = vpop.eup %2956  ;;  %2972 = vpow2.f32 %v1802_v8  ;;  %v1812_v8 = vmul.f32 1.442695, %v1624_v20 }
 0x360   :  { %2184 = vperm.xlu1 %2794, %v2953_v21   ;;  %v2959_v0 = vpop.eup %2958  ;;  %v1626_v21 = vsub.f32 %v3987_v53, %v4356_v63  ;;  %2974 = vpow2.f32 %v1786_v26 }
 0x361   :  { %v2961_v22 = vpop.eup %2960 }
 0x362   :  { %v4370_v47 = vpop.permute.xlu0 %1950  ;;  %v2963_v15 = vpop.eup %2962  ;;  %v1816_v19 = vmul.f32 1.442695, %v1626_v21  ;;  %v4956_v21 = vld [vmem:[#allocation77_spill] sm:$0xff] }
 0x363   :  { %2139 = vperm.xlu0 %2793, %v2955_v25   ;;  %v2965_v9 = vpop.eup %2964  ;;  %v1615_v51 = vsub.f32 %v4956_v21, %v4238_v59 }
 0x364   :  { %2142 = vperm.xlu1 %2794, %v2957_v37   ;;  %v2967_v37 = vpop.eup %2966  ;;  %2976 = vpow2.f32 %v1816_v19  ;;  %v1627_v19 = vsub.f32 %v3764_v43, %v4356_v63 }
 0x365   :  { %2978 = vpow2.f32 %v1800_v50 }
 0x366   :  { %v2065_v36 = vpop.permute.xlu0 %2064  ;;  %2980 = vpow2.f32 %v1812_v8 }
 0x367   :  { %v2439_v14 = vrot.slane %v2065_v36, %v3040_v12  ;;  %2157 = vperm.xlu0 %2793, %v2959_v0  }
 0x368   :  { %2163 = vperm.xlu1 %2794, %v2961_v22   ;;  %v4407_v22 = vpop.permute.xlu1 %2031 }
 0x369   :  { %v2440_v25 = vsel %vm900_vm1, %v2439_v14, %v2435_v17  ;;  %v2454_v17 = vrot.slane %v4278_v23, %v3034_v7  ;;  %v2969_v14 = vpop.eup %2968  ;;  %v1794_v23 = vmul.f32 1.442695, %v1615_v51 }
 0x36a   :  { %v2445_v53 = vsel %vm907_vm2, %v2444_v24, %v2440_v25  ;;  %v2071_v31 = vpop.permute.xlu0 %2070  ;;  %v2971_v24 = vpop.eup %2970  ;;  %v4957_v25 = vld [vmem:[#allocation81_spill] sm:$0xff] }
 0x36b   :  { %v2449_v41 = vrot.slane %v2071_v31, %v3051_v16  ;;  %2169 = vperm.xlu0 %2793, %v2963_v15   ;;  %v1623_v15 = vsub.f32 %v4957_v25, %v4324_v57  ;;  %2982 = vpow2.f32 %v1794_v23  ;;  %v1818_v57 = vmul.f32 1.442695, %v1627_v19 }
 0x36c   :  { %2187 = vperm.xlu1 %2794, %v2965_v9   ;;  %v4415_v50 = vpop.permute.xlu1 %2037  ;;  %v2211_v25 = vrot.slane %v4336_v40, %v3040_v12  ;;  %v2207_v19 = vrot.slane %v4224_v29, %v3034_v7  ;;  %v2235_v29 = vrot.slane %v4254_v34, %v3043_v13 }
 0x36d   :  { %v4395_v1 = vsel %vm914_vm3, %v2449_v41, %v2445_v53  ;;  %v2973_v53 = vpop.eup %2972  ;;  %v1810_v41 = vmul.f32 1.442695, %v1623_v15  ;;  %v2230_v15 = vrot.slane %v4344_v49, %v3040_v12 }
 0x36e   :  { %v2077_v0 = vpop.permute.xlu0 %2076  ;;  %v2975_v59 = vpop.eup %2974  ;;  %v2212_v40 = vsel %vm900_vm1, %v2211_v25, %v2207_v19 }
 0x36f   :  { %v2458_v36 = vrot.slane %v2077_v0, %v3040_v12  ;;  %2181 = vperm.xlu0 %2793, %v2967_v37   ;;  %v2977_v20 = vpop.eup %2976  ;;  %2984 = vpow2.f32 %v1810_v41  ;;  %v2226_v41 = vrot.slane %v4250_v38, %v3034_v7 }
 0x370   :  { %2196 = vperm.xlu1 %2794, %v2969_v14   ;;  %v2979_v9 = vpop.eup %2978  ;;  %2986 = vpow2.f32 %v1818_v57  ;;  %v2240_v57 = vrot.slane %v4350_v4, %v3051_v16  ;;  %v2221_v4 = vrot.slane %v4244_v48, %v3051_v16 }
 0x371   :  { %v4403_v26 = vsel %vm900_vm1, %v2458_v36, %v2454_v17  ;;  %v2981_v0 = vpop.eup %2980  ;;  %v4421_v36 = vpop.permute.xlu1 %2043  ;;  %v2231_v49 = vsel %vm900_vm1, %v2230_v15, %v2226_v41 }
 0x372   :  { %v4405_v11 = vpop.permute.xlu0 %1956 }
 0x373   :  { %2130 = vperm.xlu0 %2793, %v2971_v24   ;;  %v2268_v19 = vrot.slane %v4405_v11, %v3040_v12  ;;  %v2292_v11 = vrot.slane %v4298_v2, %v3043_v13 }
 0x374   :  { %2178 = vperm.xlu1 %2794, %v2973_v53  }
 0x375   :  { %v2983_v21 = vpop.eup %2982  ;;  %v4423_v63 = vpop.permute.xlu1 %2049 }
 0x376   :  { %v4411_v31 = vpop.permute.xlu0 %1962 }
 0x377   :  { %2154 = vperm.xlu0 %2793, %v2975_v59   ;;  %v2249_v59 = vrot.slane %v4362_v45, %v3040_v12  ;;  %v2216_v45 = vrot.slane %v4232_v44, %v3043_v13 }
 0x378   :  { %2199 = vperm.xlu1 %2794, %v2977_v20   ;;  %v2245_v20 = vrot.slane %v4260_v61, %v3034_v7  ;;  %v2259_v61 = vrot.slane %v4370_v47, %v3051_v16 }
 0x379   :  { %v2985_v51 = vpop.eup %2984  ;;  %v4429_v23 = vpop.permute.xlu1 %2055 }
 0x37a   :  { %v4417_v37 = vpop.permute.xlu0 %1968  ;;  %v2987_v14 = vpop.eup %2986  ;;  %v2250_v38 = vsel %vm900_vm1, %v2249_v59, %v2245_v20 }
 0x37b   :  { %2175 = vperm.xlu0 %2793, %v2979_v9   ;;  %v2287_v41 = vrot.slane %v4417_v37, %v3040_v12  ;;  %v2302_v37 = vrot.slane %v4304_v60, %v3034_v7 }
 0x37d   :  { %v4445_v9 = vpop.permute.xlu1 %2079 }
 0x37e   :  { %v4419_v17 = vpop.permute.xlu0 %1974 }
 0x37f   :  { %2193 = vperm.xlu0 %2793, %v2981_v0   ;;  %v2297_v2 = vrot.slane %v4419_v17, %v3051_v16  ;;  %v2359_v17 = vrot.slane %v4368_v28, %v3034_v7 }
 0x381   :  { %v4466_v15 = vpop.permute.xlu1 %2085 }
 0x382   :  { %v1981_v43 = vpop.permute.xlu0 %1980 }
 0x383   :  { %2166 = vperm.xlu0 %2793, %v2983_v21   ;;  %v2254_v21 = vrot.slane %v4264_v58, %v3043_v13 }
 0x385   :  { %v2255_v34 = vsel %vm907_vm2, %v2254_v21, %v2250_v38  ;;  %v4491_v38 = vpop.permute.xlu1 %2091 }
 0x386   :  { %v4425_v8 = vpop.permute.xlu0 %1986  ;;  %v2260_v59 = vsel %vm914_vm3, %v2259_v61, %v2255_v34 }
 0x387   :  { %2190 = vperm.xlu0 %2793, %v2985_v51   ;;  %v2217_v51 = vsel %vm907_vm2, %v2216_v45, %v2212_v40  ;;  %v2306_v40 = vrot.slane %v1981_v43, %v3040_v12  ;;  %v2283_v45 = vrot.slane %v4294_v33, %v3034_v7  ;;  %v2321_v43 = vrot.slane %v4314_v54, %v3034_v7 }
 0x388   :  { %v2222_v47 = vsel %vm914_vm3, %v2221_v4, %v2217_v51  ;;  %v2316_v21 = vrot.slane %v4425_v8, %v3051_v16  ;;  %v2378_v8 = vrot.slane %v4392_v52, %v3034_v7 }
 0x389   :  { %v2288_v33 = vsel %vm900_vm1, %v2287_v41, %v2283_v45  ;;  %v2307_v54 = vsel %vm900_vm1, %v2306_v40, %v2302_v37  ;;  %v2387_v41 = vrot.slane %v4407_v22, %v3043_v13  ;;  %v2330_v40 = vrot.slane %v4330_v42, %v3043_v13 }
 0x38a   :  { %v4427_v24 = vpop.permute.xlu0 %1992  ;;  %v2293_v34 = vsel %vm907_vm2, %v2292_v11, %v2288_v33 }
 0x38b   :  { %2202 = vperm.xlu0 %2793, %v2987_v14   ;;  %v2236_v14 = vsel %vm907_vm2, %v2235_v29, %v2231_v49  ;;  %v2264_v49 = vrot.slane %v4284_v39, %v3034_v7  ;;  %v2311_v29 = vrot.slane %v4308_v18, %v3043_v13  ;;  %v2340_v18 = vrot.slane %v4342_v55, %v3034_v7 }
 0x38c   :  { %v2241_v44 = vsel %vm914_vm3, %v2240_v57, %v2236_v14  ;;  %v2273_v57 = vrot.slane %v4288_v5, %v3043_v13  ;;  %v2349_v14 = vrot.slane %v4352_v3, %v3043_v13  ;;  %v2325_v4 = vrot.slane %v4427_v24, %v3040_v12  ;;  %v4523_v24 = vpop.permute.xlu1 %2097 }
 0x38d   :  { %v2660_v58 = vsel %vm1353_vm4, %v2241_v44, %v2222_v47  ;;  %v2269_v5 = vsel %vm900_vm1, %v2268_v19, %v2264_v49  ;;  %v2368_v55 = vrot.slane %v4378_v35, %v3043_v13  ;;  %v2298_v3 = vsel %vm914_vm3, %v2297_v2, %v2293_v34 }
 0x38e   :  { %v4435_v53 = vpop.permute.xlu0 %1998  ;;  %v2661_v20 = vsel %vm1355_vm5, %v2260_v59, %v2660_v58  ;;  %v2274_v44 = vsel %vm907_vm2, %v2273_v57, %v2269_v5  ;;  %v2312_v47 = vsel %vm907_vm2, %v2311_v29, %v2307_v54 }
 0x38f   :  { %v2684_v39 = vsel %vm1379_vm6, %v2661_v20, 0.0  ;;  %v2317_v19 = vsel %vm914_vm3, %v2316_v21, %v2312_v47  ;;  %v2335_v20 = vrot.slane %v4435_v53, %v3051_v16  ;;  %v2397_v21 = vrot.slane %v4415_v50, %v3034_v7 }
 0x390   :  { %v4548_v33 = vpop.permute.xlu1 %2103 }
 0x392   :  { %v2005_v0 = vpop.permute.xlu0 %2004 }
 0x393   :  { %v2344_v61 = vrot.slane %v2005_v0, %v3040_v12  ;;  %v2278_v0 = vrot.slane %v4411_v31, %v3051_v16 }
 0x395   :  { %v2345_v28 = vsel %vm900_vm1, %v2344_v61, %v2340_v18 }
 0x396   :  { %v2011_v25 = vpop.permute.xlu0 %2010  ;;  %v2350_v49 = vsel %vm907_vm2, %v2349_v14, %v2345_v28  ;;  %v2406_v14 = vrot.slane %v4421_v36, %v3043_v13  ;;  %v2416_v36 = vrot.slane %v4423_v63, %v3034_v7 }
 0x397   :  { %v2354_v59 = vrot.slane %v2011_v25, %v3051_v16  ;;  %v2326_v25 = vsel %vm900_vm1, %v2325_v4, %v2321_v43 }
 0x398   :  { %v2331_v53 = vsel %vm907_vm2, %v2330_v40, %v2326_v25 }
 0x399   :  { %v2355_v11 = vsel %vm914_vm3, %v2354_v59, %v2350_v49  ;;  %v2336_v5 = vsel %vm914_vm3, %v2335_v20, %v2331_v53  ;;  %v2425_v59 = vrot.slane %v4429_v23, %v3043_v13 }
 0x39a   :  { %v2017_v48 = vpop.permute.xlu0 %2016 }
 0x39b   :  { %v2363_v51 = vrot.slane %v2017_v48, %v3040_v12  ;;  %v2279_v48 = vsel %vm914_vm3, %v2278_v0, %v2274_v44 }
 0x39c   :  { %2685 = vadd.xlane.f32.xlu1 %v2684_v39  ;;  %v2662_v45 = vsel %vm1353_vm4, %v2298_v3, %v2279_v48 }
 0x39d   :  { %v2364_v35 = vsel %vm900_vm1, %v2363_v51, %v2359_v17  ;;  %v2663_v29 = vsel %vm1355_vm5, %v2317_v19, %v2662_v45 }
 0x39e   :  { %v2023_v60 = vpop.permute.xlu0 %2022  ;;  %v2369_v43 = vsel %vm907_vm2, %v2368_v55, %v2364_v35  ;;  %v2687_v61 = vsel %vm1379_vm6, %v2663_v29, 0.0 }
 0x39f   :  { %v2373_v58 = vrot.slane %v2023_v60, %v3051_v16  ;;  %v2664_v60 = vsel %vm1353_vm4, %v2355_v11, %v2336_v5 }
 0x3a1   :  { %v2374_v42 = vsel %vm914_vm3, %v2373_v58, %v2369_v43 }
 0x3a2   :  { %v2029_v31 = vpop.permute.xlu0 %2028  ;;  %v2665_v54 = vsel %vm1355_vm5, %v2374_v42, %v2664_v60 }
 0x3a3   :  { %v2382_v52 = vrot.slane %v2029_v31, %v3040_v12  ;;  %v2690_v0 = vsel %vm1379_vm6, %v2665_v54, 0.0 }
 0x3a5   :  { %v2383_v57 = vsel %vm900_vm1, %v2382_v52, %v2378_v8  ;;  %v4562_v8 = vpop.permute.xlu1 %2112 }
 0x3a6   :  { %v2388_v22 = vsel %vm907_vm2, %v2387_v41, %v2383_v57  ;;  %v2035_v37 = vpop.permute.xlu0 %2034  ;;  %v2463_v41 = vrot.slane %v4445_v9, %v3043_v13  ;;  %v2473_v9 = vrot.slane %v4466_v15, %v3034_v7 }
 0x3a7   :  { %v2392_v39 = vrot.slane %v2035_v37, %v3051_v16  ;;  %v2482_v37 = vrot.slane %v4491_v38, %v3043_v13 }
 0x3a8   :  { %v2464_v20 = vsel %vm907_vm2, %v2463_v41, %v4403_v26 }
 0x3a9   :  { %v2393_v2 = vsel %vm914_vm3, %v2392_v39, %v2388_v22  ;;  %v2122_v31 = vpop.permute.xlu1 %2121 }
 0x3aa   :  { %2688 = vadd.xlane.f32.xlu0 %v2687_v61  ;;  %v2041_v18 = vpop.permute.xlu0 %2040 }
 0x3ab   :  { %v2401_v51 = vrot.slane %v2041_v18, %v3040_v12 }
 0x3ad   :  { %v2402_v17 = vsel %vm900_vm1, %v2401_v51, %v2397_v21  ;;  %v4581_v25 = vpop.permute.xlu1 %2133 }
 0x3ae   :  { %2691 = vadd.xlane.f32.xlu0 %v2690_v0  ;;  %v2407_v4 = vsel %vm907_vm2, %v2406_v14, %v2402_v17  ;;  %v2047_v55 = vpop.permute.xlu0 %2046 }
 0x3af   :  { %v2411_v44 = vrot.slane %v2047_v55, %v3051_v16 }
 0x3b1   :  { %v2412_v34 = vsel %vm914_vm3, %v2411_v44, %v2407_v4  ;;  %v4592_v11 = vpop.permute.xlu1 %2145 }
 0x3b2   :  { %v2053_v50 = vpop.permute.xlu0 %2052  ;;  %v2666_v3 = vsel %vm1353_vm4, %v2412_v34, %v2393_v2 }
 0x3b3   :  { %v2420_v28 = vrot.slane %v2053_v50, %v3040_v12  ;;  %v2492_v50 = vrot.slane %v4523_v24, %v3034_v7 }
 0x3b5   :  { %v2421_v47 = vsel %vm900_vm1, %v2420_v28, %v2416_v36  ;;  %v2107_v15 = vpop.permute.xlu1 %2106 }
 0x3b6   :  { %v2059_v35 = vpop.permute.xlu0 %2058  ;;  %v2426_v58 = vsel %vm907_vm2, %v2425_v59, %v2421_v47  ;;  %v2515_v59 = vrot.slane %v4562_v8, %v3040_v12  ;;  %v2506_v8 = vrot.slane %v2107_v15, %v3051_v16 }
 0x3b7   :  { %v2430_v52 = vrot.slane %v2059_v35, %v3051_v16 }
 0x3b9   :  { %v2431_v19 = vsel %vm914_vm3, %v2430_v52, %v2426_v58  ;;  %v2128_v2 = vpop.permute.xlu1 %2127  ;;  %v2501_v52 = vrot.slane %v4548_v33, %v3043_v13 }
 0x3ba   :  { %v2083_v48 = vpop.permute.xlu0 %2082  ;;  %v4579_v63 = vsel %vm1355_vm5, %v2431_v19, %v2666_v3  ;;  %v2530_v19 = vrot.slane %v2122_v31, %v3034_v7 }
 0x3bb   :  { %v2468_v23 = vrot.slane %v2083_v48, %v3051_v16  ;;  %v2693_v15 = vsel %vm1379_vm6, %v4579_v63, 0.0 }
 0x3bd   :  { %v2469_v40 = vsel %vm914_vm3, %v2468_v23, %v2464_v20  ;;  %v4602_v18 = vpop.permute.xlu1 %2151 }
 0x3be   :  { %v2089_v49 = vpop.permute.xlu0 %2088  ;;  %v2668_v57 = vsel %vm1353_vm4, %v2469_v40, %v4395_v1  ;;  %v2539_v40 = vrot.slane %v2128_v2, %v3043_v13  ;;  %v2577_v63 = vrot.slane %v4602_v18, %v3043_v13 }
 0x3bf   :  { %v2477_v45 = vrot.slane %v2089_v49, %v3040_v12 }
 0x3c1   :  { %v2478_v22 = vsel %vm900_vm1, %v2477_v45, %v2473_v9  ;;  %v2161_v54 = vpop.permute.xlu1 %2160 }
 0x3c2   :  { %v2095_v29 = vpop.permute.xlu0 %2094  ;;  %v2483_v43 = vsel %vm907_vm2, %v2482_v37, %v2478_v22 }
 0x3c3   :  { %v2487_v26 = vrot.slane %v2095_v29, %v3051_v16 }
 0x3c5   :  { %v2488_v53 = vsel %vm914_vm3, %v2487_v26, %v2483_v43 }
 0x3c6   :  { %v2101_v1 = vpop.permute.xlu0 %2100  ;;  %v2669_v39 = vsel %vm1355_vm5, %v2488_v53, %v2668_v57 }
 0x3c7   :  { %v2696_v42 = vsel %vm1379_vm6, %v2669_v39, 0.0  ;;  %v2496_v44 = vrot.slane %v2101_v1, %v3040_v12 }
 0x3c8   :  { %2697 = vadd.xlane.f32.xlu1 %v2696_v42  ;;  %v2568_v42 = vrot.slane %v4592_v11, %v3034_v7  ;;  %v2591_v11 = vrot.slane %v2161_v54, %v3040_v12 }
 0x3c9   :  { %v2497_v47 = vsel %vm900_vm1, %v2496_v44, %v2492_v50 }
 0x3ca   :  { %v2110_v5 = vpop.permute.xlu0 %2109  ;;  %v2502_v48 = vsel %vm907_vm2, %v2501_v52, %v2497_v47 }
 0x3cb   :  { %v2511_v3 = vrot.slane %v2110_v5, %v3034_v7  ;;  %v2507_v31 = vsel %vm914_vm3, %v2506_v8, %v2502_v48 }
 0x3cd   :  { %v2516_v41 = vsel %vm900_vm1, %v2515_v59, %v2511_v3 }
 0x3ce   :  { %v2116_v61 = vpop.permute.xlu0 %2115 }
 0x3cf   :  { %v2520_v36 = vrot.slane %v2116_v61, %v3043_v13 }
 0x3d1   :  { %v2521_v23 = vsel %vm907_vm2, %v2520_v36, %v2516_v41 }
 0x3d2   :  { %v2125_v60 = vpop.permute.xlu0 %2124 }
 0x3d3   :  { %v2534_v28 = vrot.slane %v2125_v60, %v3040_v12  ;;  %v2549_v60 = vrot.slane %v4581_v25, %v3034_v7 }
 0x3d5   :  { %v2535_v20 = vsel %vm900_vm1, %v2534_v28, %v2530_v19 }
 0x3d6   :  { %v2137_v38 = vpop.permute.xlu0 %2136  ;;  %v2540_v9 = vsel %vm907_vm2, %v2539_v40, %v2535_v20 }
 0x3d7   :  { %v2553_v5 = vrot.slane %v2137_v38, %v3040_v12 }
 0x3d9   :  { %v2554_v38 = vsel %vm900_vm1, %v2553_v5, %v2549_v60 }
 0x3da   :  { %v2149_v21 = vpop.permute.xlu0 %2148 }
 0x3db   :  { %v4604_v51 = vpop.permute.xlu1 %2172  ;;  %v2572_v53 = vrot.slane %v2149_v21, %v3040_v12 }
 0x3dc   :  { %v2610_v48 = vrot.slane %v4604_v51, %v3040_v12 }
 0x3dd   :  { %v2573_v21 = vsel %vm900_vm1, %v2572_v53, %v2568_v42 }
 0x3de   :  { %v2119_v14 = vpop.permute.xlu0 %2118  ;;  %v2578_v36 = vsel %vm907_vm2, %v2577_v63, %v2573_v21 }
 0x3df   :  { %v4606_v0 = vpop.permute.xlu1 %2184  ;;  %v2525_v35 = vrot.slane %v2119_v14, %v3051_v16 }
 0x3e0   :  { %v2629_v47 = vrot.slane %v4606_v0, %v3040_v12 }
 0x3e1   :  { %v2526_v49 = vsel %vm914_vm3, %v2525_v35, %v2521_v23 }
 0x3e2   :  { %v2140_v17 = vpop.permute.xlu0 %2139  ;;  %v2670_v37 = vsel %vm1353_vm4, %v2526_v49, %v2507_v31 }
 0x3e3   :  { %v2143_v55 = vpop.permute.xlu1 %2142  ;;  %v2558_v2 = vrot.slane %v2140_v17, %v3043_v13 }
 0x3e4   :  { %v2563_v50 = vrot.slane %v2143_v55, %v3051_v16 }
 0x3e6   :  { %v2158_v4 = vpop.permute.xlu0 %2157 }
 0x3e7   :  { %v2164_v24 = vpop.permute.xlu1 %2163  ;;  %v2587_v61 = vrot.slane %v2158_v4, %v3034_v7  ;;  %v2559_v4 = vsel %vm907_vm2, %v2558_v2, %v2554_v38 }
 0x3e8   :  { %v2596_v17 = vrot.slane %v2164_v24, %v3043_v13  ;;  %v2564_v55 = vsel %vm914_vm3, %v2563_v50, %v2559_v4 }
 0x3e9   :  { %v2592_v25 = vsel %vm900_vm1, %v2591_v11, %v2587_v61 }
 0x3ea   :  { %v4609_v34 = vpop.permute.xlu0 %2169  ;;  %v2597_v35 = vsel %vm907_vm2, %v2596_v17, %v2592_v25 }
 0x3eb   :  { %v2188_v45 = vpop.permute.xlu1 %2187  ;;  %v2606_v52 = vrot.slane %v4609_v34, %v3034_v7 }
 0x3ec   :  { %v2634_v8 = vrot.slane %v2188_v45, %v3043_v13 }
 0x3ee   :  { %v2182_v58 = vpop.permute.xlu0 %2181 }
 0x3ef   :  { %v2197_v39 = vpop.permute.xlu1 %2196  ;;  %v2625_v28 = vrot.slane %v2182_v58, %v3034_v7 }
 0x3f0   :  { %v2648_v34 = vrot.slane %v2197_v39, %v3040_v12 }
 0x3f1   :  { %v2630_v0 = vsel %vm900_vm1, %v2629_v47, %v2625_v28 }
 0x3f2   :  { %v2131_v57 = vpop.permute.xlu0 %2130 }
 0x3f3   :  { %v2544_v33 = vrot.slane %v2131_v57, %v3051_v16  ;;  %v2179_v3 = vpop.permute.xlu1 %2178 }
 0x3f5   :  { %v2545_v22 = vsel %vm914_vm3, %v2544_v33, %v2540_v9  ;;  %v2611_v33 = vsel %vm900_vm1, %v2610_v48, %v2606_v52  ;;  %v2635_v9 = vsel %vm907_vm2, %v2634_v8, %v2630_v0 }
 0x3f6   :  { %v2155_v29 = vpop.permute.xlu0 %2154  ;;  %v2671_v26 = vsel %vm1355_vm5, %v2545_v22, %v2670_v37  ;;  %v2620_v22 = vrot.slane %v2179_v3, %v3051_v16 }
 0x3f7   :  { %v2699_v43 = vsel %vm1379_vm6, %v2671_v26, 0.0  ;;  %v2582_v14 = vrot.slane %v2155_v29, %v3051_v16  ;;  %v2200_v40 = vpop.permute.xlu1 %2199 }
 0x3f8   :  { %2700 = vadd.xlane.f32.xlu0 %v2699_v43  ;;  %v2653_v45 = vrot.slane %v2200_v40, %v3043_v13 }
 0x3f9   :  { %v2583_v59 = vsel %vm914_vm3, %v2582_v14, %v2578_v36 }
 0x3fa   :  { %v2176_v1 = vpop.permute.xlu0 %2175  ;;  %v2672_v41 = vsel %vm1353_vm4, %v2583_v59, %v2564_v55 }
 0x3fb   :  { %v2615_v19 = vrot.slane %v2176_v1, %v3043_v13 }
 0x3fc   :  { %2694 = vadd.xlane.f32.xlu0 %v2693_v15 }
 0x3fd   :  { %v2616_v31 = vsel %vm907_vm2, %v2615_v19, %v2611_v33 }
 0x3fe   :  { %v2194_v44 = vpop.permute.xlu0 %2193  ;;  %v2621_v26 = vsel %vm914_vm3, %v2620_v22, %v2616_v31 }
 0x3ff   :  { %v2644_v24 = vrot.slane %v2194_v44, %v3034_v7 }
 0x401   :  { %v2649_v51 = vsel %vm900_vm1, %v2648_v34, %v2644_v24 }
 0x402   :  { %v2167_v18 = vpop.permute.xlu0 %2166  ;;  %v2654_v43 = vsel %vm907_vm2, %v2653_v45, %v2649_v51 }
 0x403   :  { %v2601_v54 = vrot.slane %v2167_v18, %v3051_v16 }
 0x405   :  { %v2602_v58 = vsel %vm914_vm3, %v2601_v54, %v2597_v35 }
 0x406   :  { %v2191_v23 = vpop.permute.xlu0 %2190  ;;  %v2673_v20 = vsel %vm1355_vm5, %v2602_v58, %v2672_v41 }
 0x407   :  { %v2639_v49 = vrot.slane %v2191_v23, %v3051_v16  ;;  %v2702_v57 = vsel %vm1379_vm6, %v2673_v20, 0.0 }
 0x408   :  { %2703 = vadd.xlane.f32.xlu1 %v2702_v57 }
 0x409   :  { %v2640_v12 = vsel %vm914_vm3, %v2639_v49, %v2635_v9 }
 0x40a   :  { %v2203_v37 = vpop.permute.xlu0 %2202  ;;  %v2674_v1 = vsel %vm1353_vm4, %v2640_v12, %v2621_v26 }
 0x40b   :  { %v2658_v29 = vrot.slane %v2203_v37, %v3051_v16 }
 0x40d   :  { %v2659_v53 = vsel %vm914_vm3, %v2658_v29, %v2654_v43 }
 0x40e   :  { %v2675_v39 = vsel %vm1355_vm5, %v2659_v53, %v2674_v1 }
 0x40f   :  { %v2705_v15 = vsel %vm1379_vm6, %v2675_v39, 0.0 }
 0x410   :  { %2706 = vadd.xlane.f32.xlu0 %v2705_v15 }
 0x429   :  { %v2686_v2 = vpop.xlane.xlu1 %2685 }
 0x42a   :  { %2988 = vlog2.f32 %v2686_v2 }
 0x434   :  { %v2989_v60 = vpop.eup %2988 }
 0x435   :  { %v2709_v50 = vmul.f32 0.6931472, %v2989_v60 }
 0x437   :  { %v2689_v42 = vpop.xlane.xlu0 %2688  ;;  %v2724_v59 = vadd.f32 %v2709_v50, %v3990_v10 }
 0x438   :  { %2990 = vlog2.f32 %v2689_v42 }
 0x439   :  { %v2743_v19 = vrot.slane %v2724_v59, %v3034_v7 }
 0x43b   :  { %v2692_v13 = vpop.xlane.xlu0 %2691 }
 0x43c   :  { %2992 = vlog2.f32 %v2692_v13 }
 0x442   :  { %v2991_v14 = vpop.eup %2990 }
 0x443   :  { %v2711_v11 = vmul.f32 0.6931472, %v2991_v14 }
 0x445   :  { %v2725_v25 = vadd.f32 %v2711_v11, %v4044_v32 }
 0x446   :  { %v2993_v44 = vpop.eup %2992 }
 0x447   :  { %v2713_v38 = vmul.f32 0.6931472, %v2993_v44  ;;  %v2747_v55 = vrot.slane %v2725_v25, %v3034_v7 }
 0x449   :  { %v2726_v36 = vadd.f32 %v2713_v38, %v4070_v6  ;;  %v2772_v58 = vsel %vm1353_vm4, %v2747_v55, %v2743_v19 }
 0x44b   :  { %v2751_v35 = vrot.slane %v2726_v36, %v3034_v7 }
 0x44d   :  { %v2773_v10 = vsel %vm1355_vm5, %v2751_v35, %v2772_v58 }
 0x455   :  { %v2698_v16 = vpop.xlane.xlu1 %2697 }
 0x485   :  { %v2701_v5 = vpop.xlane.xlu0 %2700 }
 0x489   :  { %v2695_v61 = vpop.xlane.xlu0 %2694 }
 0x48a   :  { %2994 = vlog2.f32 %v2695_v61 }
 0x48b   :  { %2996 = vlog2.f32 %v2698_v16 }
 0x48c   :  { %2998 = vlog2.f32 %v2701_v5 }
 0x494   :  { %v2995_v63 = vpop.eup %2994 }
 0x495   :  { %v2704_v21 = vpop.xlane.xlu1 %2703  ;;  %v2715_v17 = vmul.f32 0.6931472, %v2995_v63  ;;  %v2997_v4 = vpop.eup %2996 }
 0x496   :  { %3000 = vlog2.f32 %v2704_v21  ;;  %v2999_v28 = vpop.eup %2998  ;;  %v2717_v47 = vmul.f32 0.6931472, %v2997_v4 }
 0x497   :  { %v2727_v18 = vadd.f32 %v2715_v17, %v4098_v27  ;;  %v2719_v24 = vmul.f32 0.6931472, %v2999_v28 }
 0x498   :  { %v2728_v6 = vadd.f32 %v2717_v47, %v4026_v46 }
 0x499   :  { %v2755_v32 = vrot.slane %v2727_v18, %v3034_v7  ;;  %v2729_v41 = vadd.f32 %v2719_v24, %v4172_v56 }
 0x49a   :  { %v2759_v23 = vrot.slane %v2728_v6, %v3034_v7 }
 0x49b   :  { %v2775_v48 = vsel %vm2774_vm7, %v2755_v32, %v2773_v10  ;;  %v2763_v46 = vrot.slane %v2729_v41, %v3034_v7 }
 0x49c   :  { %v2777_v8 = vsel %vm2776_vm8, %v2759_v23, %v2775_v48 }
 0x49d   :  { %v2707_v3 = vpop.xlane.xlu0 %2706  ;;  %v2779_v49 = vsel %vm2778_vm9, %v2763_v46, %v2777_v8 }
 0x49e   :  { %3002 = vlog2.f32 %v2707_v3 }
 0x4a0   :  { %v3001_v54 = vpop.eup %3000 }
 0x4a1   :  { %v2721_v52 = vmul.f32 0.6931472, %v3001_v54 }
 0x4a3   :  { %v2730_v27 = vadd.f32 %v2721_v52, %v4086_v62 }
 0x4a5   :  { %v2767_v34 = vrot.slane %v2730_v27, %v3034_v7 }
 0x4a7   :  { %v2781_v56 = vsel %vm2780_vm10, %v2767_v34, %v2779_v49 }
 0x4a8   :  { %v3003_v0 = vpop.eup %3002 }
 0x4a9   :  { %v2723_v20 = vmul.f32 0.6931472, %v3003_v0 }
 0x4ab   :  { %v2731_v40 = vadd.f32 %v2723_v20, %v4316_v30 }
 0x4ad   :  { %v2771_v62 = vrot.slane %v2731_v40, %v3034_v7 }
 0x4af   :  { %v2783_v57 = vsel %vm2782_vm11, %v2771_v62, %v2781_v56 }
 0x4b0   :  { %2786 = vst.msk [vmem:[%s4717_s3] sm:$0xff] %vm2785_vm12, %v2783_v57 }

</bundles_post_ra>
